<compile_context>
chip_gen: v5e
topology: v5e:2x2
jax: 0.10.0
libtpu: 0.0.40
codegen_flags: <defaults>
</compile_context>

<pallas_src>
import jax
import jax.numpy as jnp
from jax.experimental import pallas as pl
from jax.experimental.pallas import tpu as pltpu

K_IN = 28 * 28          # 784 (784 % 8 == 0, so the w1 sublane dim tiles cleanly)
H1 = 512
H2 = 256


def _leaky_relu(x, slope=0.2):
    # slope < 1  =>  LeakyReLU(x) == max(x, slope*x); cheaper than where/select.
    return jnp.maximum(x, slope * x)


def discriminator_kernel(x_ref, w1_ref, b1_ref, w2_ref, b2_ref, w3t_ref, b3_ref, out_ref):
    # Whole MLP tile is VMEM-resident; two MXU matmuls + one VPU/XLU dot, fused.
    x = x_ref[...].astype(jnp.bfloat16)                                    # (bm, 784) cast on VPU
    h1 = jnp.dot(x, w1_ref[...], preferred_element_type=jnp.float32) + b1_ref[...]
    h1 = _leaky_relu(h1)                                                   # (bm, 512) f32
    h2 = jnp.dot(h1.astype(jnp.bfloat16), w2_ref[...],
                 preferred_element_type=jnp.float32) + b2_ref[...]
    h2 = _leaky_relu(h2)                                                   # (bm, 256) f32
    # Layer 3 (256 -> 1): VPU multiply + cross-lane reduce; avoids a 128x lane-padded
    # MXU matmul and a 128x-padded f32 output store.
    h3 = jnp.sum(h2 * w3t_ref[...], axis=-1, keepdims=True) + b3_ref[...]  # (bm, 1) f32
    # NOTE: sigmoid kept to match the PyTorch module; a logits variant (fused with
    # sigmoid-BCE downstream) would be numerically nicer for training.
    out_ref[...] = jax.nn.sigmoid(h3)


def _cdiv(a, b):
    return (a + b - 1) // b


def _round_up(n, m):
    return _cdiv(n, m) * m


def _choose_bm(B, desired=512):
    # Big tiles amortize the ~0.35 us per-grid-step overhead, but cap the tile so the
    # grid stays >= 2 when the batch allows it (v7x has 2 TensorCores sharing the
    # "parallel" grid axis).  Tile must be a multiple of 8 (sublane).
    half = _round_up(_cdiv(max(B, 1), 2), 8)
    return max(8, min(desired, half))


def discriminator_forward(x, params, *, bm=512):
    """x: any shape flattening to (-1, 784) row-major (matches x.view(-1, 28*28))."""
    w1, b1, w2, b2, w3, b3 = params

    x2d = x.reshape(-1, K_IN).astype(jnp.float32)
    B = x2d.shape[0]
    bm_eff = _choose_bm(B, bm)
    B_pad = _round_up(max(B, 1), bm_eff)

    # Batch pad only (zero rows); skipped entirely when B is already a tile multiple.
    xp = x2d if B_pad == B else jnp.pad(x2d, ((0, B_pad - B), (0, 0)))

    # Weights: one-time bf16 cast (MXU-native); biases stay f32.  Layer-3 weight is
    # passed as a (1, 256) f32 row for the VPU path.
    w1b = w1.astype(jnp.bfloat16)
    w2b = w2.astype(jnp.bfloat16)
    w3t = w3.reshape(1, H2).astype(jnp.float32)
    b1r = b1.reshape(1, H1).astype(jnp.float32)
    b2r = b2.reshape(1, H2).astype(jnp.float32)
    b3r = b3.reshape(1, 1).astype(jnp.float32)

    grid = (B_pad // bm_eff,)
    out_padded = pl.pallas_call(
        discriminator_kernel,
        out_shape=jax.ShapeDtypeStruct((B_pad, 1), jnp.float32),
        grid_spec=pltpu.PrefetchScalarGridSpec(
            num_scalar_prefetch=0,
            grid=grid,
            in_specs=[
                pl.BlockSpec((bm_eff, K_IN), lambda i: (i, 0)),  # x tile (batch-tiled, f32)
                pl.BlockSpec((K_IN, H1), lambda i: (0, 0)),      # W1 bf16 (full, VMEM-resident)
                pl.BlockSpec((1, H1), lambda i: (0, 0)),         # b1
                pl.BlockSpec((H1, H2), lambda i: (0, 0)),        # W2 bf16
                pl.BlockSpec((1, H2), lambda i: (0, 0)),         # b2
                pl.BlockSpec((1, H2), lambda i: (0, 0)),         # W3 row (f32, VPU path)
                pl.BlockSpec((1, 1), lambda i: (0, 0)),          # b3
            ],
            out_specs=pl.BlockSpec((bm_eff, 1), lambda i: (i, 0)),  # compact (bm, 1) store
        ),
        compiler_params=pltpu.CompilerParams(
            dimension_semantics=("parallel",),
        ),
    )(xp, w1b, b1r, w2b, b2r, w3t, b3r)

    return out_padded if B_pad == B else out_padded[:B]


def init_params(key):
    k1, k2, k3 = jax.random.split(key, 3)
    # Deterministic synthetic init (scaled normal); shapes follow nn.Linear dims (transposed).
    w1 = jax.random.normal(k1, (K_IN, H1), jnp.float32) * 0.02
    b1 = jnp.zeros((1, H1), jnp.float32)
    w2 = jax.random.normal(k2, (H1, H2), jnp.float32) * 0.02
    b2 = jnp.zeros((1, H2), jnp.float32)
    w3 = jax.random.normal(k3, (H2, 1), jnp.float32) * 0.02
    b3 = jnp.zeros((1, 1), jnp.float32)
    return (w1, b1, w2, b2, w3, b3)


def reference_forward(x, params):
    # Pure-JAX reference with the same precision recipe as the kernel:
    # bf16 MXU inputs + f32 accumulation for layers 1/2, f32 VPU dot for layer 3.
    w1, b1, w2, b2, w3, b3 = params
    x2d = x.reshape(-1, K_IN).astype(jnp.float32)
    h1 = _leaky_relu(jnp.dot(x2d.astype(jnp.bfloat16), w1.astype(jnp.bfloat16),
                             preferred_element_type=jnp.float32) + b1.reshape(1, H1))
    h2 = _leaky_relu(jnp.dot(h1.astype(jnp.bfloat16), w2.astype(jnp.bfloat16),
                             preferred_element_type=jnp.float32) + b2.reshape(1, H2))
    h3 = jnp.sum(h2 * w3.reshape(1, H2), axis=-1, keepdims=True) + b3.reshape(1, 1)
    return jax.nn.sigmoid(h3)


if __name__ == "__main__":
    key = jax.random.PRNGKey(0)
    kx, kx2, kp = jax.random.split(key, 3)
    params = init_params(kp)

    # MNIST-like input: batch=8, 1 channel, 28x28 (NCHW), consistent with x.view(-1, 784).
    x = jax.random.normal(kx, (8, 1, 28, 28), jnp.float32)
    out = jax.block_until_ready(discriminator_forward(x, params))
    ref = reference_forward(x, params)
    assert out.shape == (8, 1)
    assert jnp.allclose(out, ref, atol=2e-3, rtol=2e-3), "mismatch vs reference (batch=8)"

    # Odd batch size exercises batch-padding, the bm heuristic, and a multi-step grid.
    x2 = jax.random.normal(kx2, (13, 1, 28, 28), jnp.float32)
    out2 = jax.block_until_ready(discriminator_forward(x2, params))
    ref2 = reference_forward(x2, params)
    assert out2.shape == (13, 1)
    assert jnp.allclose(out2, ref2, atol=2e-3, rtol=2e-3), "mismatch vs reference (batch=13)"

    print("KERNEL_OK")
</pallas_src>

<mosaic_0001>
module attributes {stable_mosaic.version = 11 : i64} {
  func.func @discriminator_kernel(%arg0: i32, %arg1: memref<8x784xf32, #tpu.memory_space<vmem>>, %arg2: memref<784x512xbf16, #tpu.memory_space<vmem>>, %arg3: memref<1x512xf32, #tpu.memory_space<vmem>>, %arg4: memref<512x256xbf16, #tpu.memory_space<vmem>>, %arg5: memref<1x256xf32, #tpu.memory_space<vmem>>, %arg6: memref<1x256xf32, #tpu.memory_space<vmem>>, %arg7: memref<1x1xf32, #tpu.memory_space<vmem>>, %arg8: memref<8x1xf32, #tpu.memory_space<vmem>>) attributes {dimension_semantics = [#tpu.dimension_semantics<parallel>], iteration_bounds = array<i64: 1>, scalar_prefetch = 0 : i64, scratch_operands = 0 : i64, tpu.core_type = #tpu.core_type<tc>, window_params = [{transform_indices = @transform_0, window_bounds = array<i64: 8, 784>}, {pipeline_mode = #tpu.pipeline_mode<synchronous>, transform_indices = @transform_1, window_bounds = array<i64: 784, 512>}, {pipeline_mode = #tpu.pipeline_mode<synchronous>, transform_indices = @transform_2, window_bounds = array<i64: 1, 512>}, {pipeline_mode = #tpu.pipeline_mode<synchronous>, transform_indices = @transform_3, window_bounds = array<i64: 512, 256>}, {pipeline_mode = #tpu.pipeline_mode<synchronous>, transform_indices = @transform_4, window_bounds = array<i64: 1, 256>}, {pipeline_mode = #tpu.pipeline_mode<synchronous>, transform_indices = @transform_5, window_bounds = array<i64: 1, 256>}, {pipeline_mode = #tpu.pipeline_mode<synchronous>, transform_indices = @transform_6, window_bounds = array<i64: 1, 1>}, {transform_indices = @transform_7, window_bounds = array<i64: 8, 1>}]} {
    %c0 = arith.constant 0 : index
    %c0_0 = arith.constant 0 : index
    %0 = vector.load %arg1[%c0, %c0_0] : memref<8x784xf32, #tpu.memory_space<vmem>>, vector<8x784xf32>
    %1 = arith.truncf %0 : vector<8x784xf32> to vector<8x784xbf16>
    %c0_1 = arith.constant 0 : index
    %c0_2 = arith.constant 0 : index
    %2 = vector.load %arg2[%c0_1, %c0_2] : memref<784x512xbf16, #tpu.memory_space<vmem>>, vector<784x512xbf16>
    %cst = arith.constant dense<0.000000e+00> : vector<8x512xf32>
    %3 = tpu.matmul %1, %2, %cst {dimension_numbers = #tpu.dot_dimension_numbers<[1], [0], [0], [1], [0, 0, 1, 1], [], []>} : vector<8x784xbf16>, vector<784x512xbf16>, vector<8x512xf32> -> vector<8x512xf32>
    %c0_3 = arith.constant 0 : index
    %c0_4 = arith.constant 0 : index
    %4 = vector.load %arg3[%c0_3, %c0_4] : memref<1x512xf32, #tpu.memory_space<vmem>>, vector<1x512xf32>
    %5 = vector.broadcast %4 : vector<1x512xf32> to vector<8x512xf32>
    %6 = arith.addf %3, %5 : vector<8x512xf32>
    %cst_5 = arith.constant 2.000000e-01 : f32
    %7 = vector.broadcast %cst_5 : f32 to vector<8x512xf32>
    %8 = arith.mulf %7, %6 : vector<8x512xf32>
    %9 = arith.maximumf %6, %8 : vector<8x512xf32>
    %10 = arith.truncf %9 : vector<8x512xf32> to vector<8x512xbf16>
    %c0_6 = arith.constant 0 : index
    %c0_7 = arith.constant 0 : index
    %11 = vector.load %arg4[%c0_6, %c0_7] : memref<512x256xbf16, #tpu.memory_space<vmem>>, vector<512x256xbf16>
    %cst_8 = arith.constant dense<0.000000e+00> : vector<8x256xf32>
    %12 = tpu.matmul %10, %11, %cst_8 {dimension_numbers = #tpu.dot_dimension_numbers<[1], [0], [0], [1], [0, 0, 1, 1], [], []>} : vector<8x512xbf16>, vector<512x256xbf16>, vector<8x256xf32> -> vector<8x256xf32>
    %c0_9 = arith.constant 0 : index
    %c0_10 = arith.constant 0 : index
    %13 = vector.load %arg5[%c0_9, %c0_10] : memref<1x256xf32, #tpu.memory_space<vmem>>, vector<1x256xf32>
    %14 = vector.broadcast %13 : vector<1x256xf32> to vector<8x256xf32>
    %15 = arith.addf %12, %14 : vector<8x256xf32>
    %cst_11 = arith.constant 2.000000e-01 : f32
    %16 = vector.broadcast %cst_11 : f32 to vector<8x256xf32>
    %17 = arith.mulf %16, %15 : vector<8x256xf32>
    %18 = arith.maximumf %15, %17 : vector<8x256xf32>
    %c0_12 = arith.constant 0 : index
    %c0_13 = arith.constant 0 : index
    %19 = vector.load %arg6[%c0_12, %c0_13] : memref<1x256xf32, #tpu.memory_space<vmem>>, vector<1x256xf32>
    %20 = vector.broadcast %19 : vector<1x256xf32> to vector<8x256xf32>
    %21 = arith.mulf %18, %20 : vector<8x256xf32>
    %cst_14 = arith.constant dense<0.000000e+00> : vector<8xf32>
    %22 = vector.multi_reduction <add>, %21, %cst_14 [1] : vector<8x256xf32> to vector<8xf32>
    %23 = vector.shape_cast %22 : vector<8xf32> to vector<8x1xf32>
    %c0_15 = arith.constant 0 : index
    %c0_16 = arith.constant 0 : index
    %24 = vector.load %arg7[%c0_15, %c0_16] : memref<1x1xf32, #tpu.memory_space<vmem>>, vector<1x1xf32>
    %25 = vector.broadcast %24 : vector<1x1xf32> to vector<8x1xf32>
    %26 = arith.addf %23, %25 : vector<8x1xf32>
    %27 = arith.negf %26 : vector<8x1xf32>
    %28 = math.exp %27 : vector<8x1xf32>
    %cst_17 = arith.constant 1.000000e+00 : f32
    %29 = vector.broadcast %cst_17 : f32 to vector<8x1xf32>
    %30 = arith.addf %29, %28 : vector<8x1xf32>
    %31 = arith.divf %29, %30 : vector<8x1xf32>
    %c0_18 = arith.constant 0 : index
    %c0_19 = arith.constant 0 : index
    %32 = vector.load %arg8[%c0_18, %c0_19] : memref<8x1xf32, #tpu.memory_space<vmem>>, vector<8x1xf32>
    tpu.vector_store %arg8[%c0_18, %c0_19], %31 {strides = array<i32>} : memref<8x1xf32, #tpu.memory_space<vmem>>, vector<8x1xf32>,
    return
  }
  func.func @transform_0(%arg0: i32) -> (i32, i32) {
    %c0_i32 = arith.constant 0 : i32
    %c0_i32_0 = arith.constant 0 : i32
    return %arg0, %c0_i32 : i32, i32
  }
  func.func @transform_1(%arg0: i32) -> (i32, i32) {
    %c0_i32 = arith.constant 0 : i32
    %c0_i32_0 = arith.constant 0 : i32
    %c0_i32_1 = arith.constant 0 : i32
    return %c0_i32, %c0_i32_0 : i32, i32
  }
  func.func @transform_2(%arg0: i32) -> (i32, i32) {
    %c0_i32 = arith.constant 0 : i32
    %c0_i32_0 = arith.constant 0 : i32
    %c0_i32_1 = arith.constant 0 : i32
    return %c0_i32, %c0_i32_0 : i32, i32
  }
  func.func @transform_3(%arg0: i32) -> (i32, i32) {
    %c0_i32 = arith.constant 0 : i32
    %c0_i32_0 = arith.constant 0 : i32
    %c0_i32_1 = arith.constant 0 : i32
    return %c0_i32, %c0_i32_0 : i32, i32
  }
  func.func @transform_4(%arg0: i32) -> (i32, i32) {
    %c0_i32 = arith.constant 0 : i32
    %c0_i32_0 = arith.constant 0 : i32
    %c0_i32_1 = arith.constant 0 : i32
    return %c0_i32, %c0_i32_0 : i32, i32
  }
  func.func @transform_5(%arg0: i32) -> (i32, i32) {
    %c0_i32 = arith.constant 0 : i32
    %c0_i32_0 = arith.constant 0 : i32
    %c0_i32_1 = arith.constant 0 : i32
    return %c0_i32, %c0_i32_0 : i32, i32
  }
  func.func @transform_6(%arg0: i32) -> (i32, i32) {
    %c0_i32 = arith.constant 0 : i32
    %c0_i32_0 = arith.constant 0 : i32
    %c0_i32_1 = arith.constant 0 : i32
    return %c0_i32, %c0_i32_0 : i32, i32
  }
  func.func @transform_7(%arg0: i32) -> (i32, i32) {
    %c0_i32 = arith.constant 0 : i32
    %c0_i32_0 = arith.constant 0 : i32
    return %arg0, %c0_i32 : i32, i32
  }
}

</mosaic_0001>

<bundles_post_ra>
// kernel: tpu_custom_call.1
= control target key start
LH: loop header
LB: loop body
LE: loop exit
PB: predicated region body
PF: predicated region fallthrough
CT: control target
= control target key end

     0   :  { %s3779_s0 = inlined_call_operand.hbm [shape: f32[8,784], index: 0, kind: input, shape index: {}]   ;;  %s3780_s1 = inlined_call_operand.hbm [shape: bf16[784,512], index: 1, kind: input, shape index: {}]   ;;  %s3781_s2 = inlined_call_operand.hbm [shape: f32[1,512], index: 2, kind: input, shape index: {}]   ;;  %s3782_s3 = inlined_call_operand.hbm [shape: bf16[512,256], index: 3, kind: input, shape index: {}]   ;;  %s3783_s4 = inlined_call_operand.vmem [shape: f32[1,256], index: 4, kind: input, shape index: {}]   ;;  %s3784_s5 = inlined_call_operand.vmem [shape: f32[1,256], index: 5, kind: input, shape index: {}]   ;;  %s3785_s6 = inlined_call_operand.<no memory space> [shape: f32[1,1], index: 6, kind: input, shape index: {}]   ;;  %s3786_s7 = inlined_call_operand.vmem [shape: f32[8,1], index: 7, kind: output, shape index: {}]  }
   0x1   :  { %v12_v0 = vstv %s3785_s6 }
   0x2   :  { %13 = vst [vmem:[#allocation2] sm:$0x1] %v12_v0 }
   0x3   :  { %14 = vsyncpa [#allocation4], 0 }
   0x4   :  { %15 = vsyncpa [#allocation6], 0  ;;  %s32_s28 = sshll.u32 %s3780_s1, 4  ;;  %s33_s28 = int_to_ptr.hbm [resolvable:$true] %s32_s28 }
   0x5   :  { %16 = vsyncpa [#allocation9], 0  ;;  %s3630_s29 = smov [#allocation5]   ;;  %s22_s10 = sshll.u32 %s3779_s0, 4  ;;  %s23_s10 = int_to_ptr.hbm [resolvable:$true] %s22_s10 }
   0x6   :  { %s34_s30 = sshll.u32 %s3630_s29, 4  ;;  %s3631_s11 = smov 256   ;;  %s35_s30 = int_to_ptr.vmem [resolvable:$true] %s34_s30 }
   0x7   :  { %s3632_s12 = smov 16   ;;  %s3633_s6 = smov [#allocation3]  }
   0x8   :  { %40 = dma.hbm_to_vmem [thread:$0]  %s33_s28, 25088, %s35_s30, [#allocation6], %s3631_s11, %s3631_s11, %s3632_s12  }
   0x9   :  { %s24_s13 = sshll.u32 %s3633_s6, 4  ;;  %s46_s16 = sshll.u32 %s3781_s2, 4  ;;  %s25_s13 = int_to_ptr.vmem [resolvable:$true] %s24_s13  ;;  %s47_s16 = int_to_ptr.hbm [resolvable:$true] %s46_s16 }
   0xa   :  { %27 = dma.hbm_to_vmem [thread:$0]  %s23_s10, 896, %s25_s13, [#allocation4]  }
   0xb   :  { %s56_s18 = sshll.u32 %s3782_s3, 4  ;;  %s3634_s19 = smov [#allocation7]   ;;  %s57_s18 = int_to_ptr.hbm [resolvable:$true] %s56_s18 }
   0xc   :  { %s48_s20 = sshll.u32 %s3634_s19, 4  ;;  %s3635_s0 = smov [#allocation8]   ;;  %s49_s20 = int_to_ptr.vmem [resolvable:$true] %s48_s20 }
   0xd   :  { %51 = dma.hbm_to_vmem [thread:$0]  %s47_s16, 64, %s49_s20, [#allocation6]  }
   0xe   :  { %s58_s21 = sshll.u32 %s3635_s0, 4  ;;  %s3636_s22 = smov 128   ;;  %s59_s21 = int_to_ptr.vmem [resolvable:$true] %s58_s21 }
   0xf   :  { %s3637_s23 = smov 8  }
  0x10   :  { %64 = dma.hbm_to_vmem [thread:$0]  %s57_s18, 8192, %s59_s21, [#allocation9], %s3636_s22, %s3636_s22, %s3637_s23  }
  0x11   :  { %3624 = dma.done.wait [#allocation4], 896  }
  0x12   :  { %3625 = vsyncadd [#allocation4], 4294966400 }
  0x13   :  { %3626 = dma.done.wait [#allocation6], 25152  }
  0x14   :  { %3627 = vsyncadd [#allocation6], 4294942144 }
  0x15   :  { %3628 = dma.done.wait [#allocation9], 8192  }
  0x16   :  { %3629 = vsyncadd [#allocation9], 4294959104  ;;  %v2324_v1 = vld [vmem:[#allocation5 + $0xe0] sm:$0xf]  ;;  %v3285_v2 = vld [vmem:[#allocation5 + $0xec] sm:$0xf0] }
  0x17   :  { %v2452_v3 = vld [vmem:[#allocation5 + $0x1e0] sm:$0xf]  ;;  %v2325_v4 = vor.u32 %v3285_v2, %v2324_v1  ;;  %v3317_v5 = vld [vmem:[#allocation5 + $0x1ec] sm:$0xf0]  ;;  %vm1288_vm0 = vcmask 130048   ;;  %vm2201_vm4 = vcmask 7168  }
  0x18   :  { %v2580_v6 = vld [vmem:[#allocation5 + $0x2e0] sm:$0xf]  ;;  %v3349_v7 = vld [vmem:[#allocation5 + $0x2ec] sm:$0xf0]  ;;  %v2453_v8 = vor.u32 %v3317_v5, %v2452_v3 }
  0x19   :  { %v2581_v9 = vor.u32 %v3349_v7, %v2580_v6  ;;  %v2708_v10 = vld [vmem:[#allocation5 + $0x3e0] sm:$0xf]  ;;  %v3381_v11 = vld [vmem:[#allocation5 + $0x3ec] sm:$0xf0]  ;;  %1292 = vmatpush.bf16.msra.mxu0 %v2325_v4 }
  0x1a   :  { %v2308_v12 = vld [vmem:[#allocation5 + $0xc0] sm:$0xf]  ;;  %v2709_v13 = vor.u32 %v3381_v11, %v2708_v10  ;;  %v3281_v14 = vld [vmem:[#allocation5 + $0xcc] sm:$0xf0]  ;;  %1305 = vmatpush.bf16.msra.mxu1 %v2453_v8 }
  0x1b   :  { %v2436_v15 = vld [vmem:[#allocation5 + $0x1c0] sm:$0xf]  ;;  %v3313_v16 = vld [vmem:[#allocation5 + $0x1cc] sm:$0xf0]  ;;  %1318 = vmatpush.bf16.msra.mxu2 %v2581_v9  ;;  %v2309_v17 = vor.u32 %v3281_v14, %v2308_v12 }
  0x1c   :  { %v2437_v18 = vor.u32 %v3313_v16, %v2436_v15  ;;  %v2564_v19 = vld [vmem:[#allocation5 + $0x2c0] sm:$0xf]  ;;  %v3345_v20 = vld [vmem:[#allocation5 + $0x2cc] sm:$0xf0]  ;;  %1331 = vmatpush.bf16.msra.mxu3 %v2709_v13 }
  0x1d   :  { %v2692_v21 = vld [vmem:[#allocation5 + $0x3c0] sm:$0xf]  ;;  %v2565_v22 = vor.u32 %v3345_v20, %v2564_v19  ;;  %v3377_v23 = vld [vmem:[#allocation5 + $0x3cc] sm:$0xf0]  ;;  %1293 = vmatpush.bf16.msra.mxu0 %v2309_v17 }
  0x1e   :  { %v2292_v24 = vld [vmem:[#allocation5 + $0xa0] sm:$0xf]  ;;  %v3277_v25 = vld [vmem:[#allocation5 + $0xac] sm:$0xf0]  ;;  %v2693_v26 = vor.u32 %v3377_v23, %v2692_v21  ;;  %1306 = vmatpush.bf16.msra.mxu1 %v2437_v18 }
  0x1f   :  { %v2420_v27 = vld [vmem:[#allocation5 + $0x1a0] sm:$0xf]  ;;  %v3309_v28 = vld [vmem:[#allocation5 + $0x1ac] sm:$0xf0]  ;;  %v2293_v30 = vor.u32 %v3277_v25, %v2292_v24  ;;  %1319 = vmatpush.bf16.msra.mxu2 %v2565_v22 }
  0x20   :  { %v2548_v29 = vld [vmem:[#allocation5 + $0x2a0] sm:$0xf]  ;;  %v3341_v31 = vld [vmem:[#allocation5 + $0x2ac] sm:$0xf0]  ;;  %v2421_v34 = vor.u32 %v3309_v28, %v2420_v27  ;;  %1332 = vmatpush.bf16.msra.mxu3 %v2693_v26 }
  0x21   :  { %v2676_v32 = vld [vmem:[#allocation5 + $0x3a0] sm:$0xf]  ;;  %v3373_v33 = vld [vmem:[#allocation5 + $0x3ac] sm:$0xf0]  ;;  %v2549_v35 = vor.u32 %v3341_v31, %v2548_v29  ;;  %1294 = vmatpush.bf16.msra.mxu0 %v2293_v30 }
  0x22   :  { %v2276_v36 = vld [vmem:[#allocation5 + $0x80] sm:$0xf]  ;;  %v3273_v37 = vld [vmem:[#allocation5 + $0x8c] sm:$0xf0]  ;;  %v2677_v39 = vor.u32 %v3373_v33, %v2676_v32  ;;  %1307 = vmatpush.bf16.msra.mxu1 %v2421_v34  ;;  %v3283_v34 = vld [vmem:[#allocation5 + $0xe4] sm:$0xf] }
  0x23   :  { %v2404_v38 = vld [vmem:[#allocation5 + $0x180] sm:$0xf]  ;;  %v3305_v40 = vld [vmem:[#allocation5 + $0x18c] sm:$0xf0]  ;;  %v2277_v45 = vor.u32 %v3273_v37, %v2276_v36  ;;  %1320 = vmatpush.bf16.msra.mxu2 %v2549_v35  ;;  %v2326_v35 = vld [vmem:[#allocation5 + $0xf0] sm:$0xf0] }
  0x24   :  { %v2532_v41 = vld [vmem:[#allocation5 + $0x280] sm:$0xf]  ;;  %v3337_v42 = vld [vmem:[#allocation5 + $0x28c] sm:$0xf0]  ;;  %v2405_v46 = vor.u32 %v3305_v40, %v2404_v38  ;;  %1333 = vmatpush.bf16.msra.mxu3 %v2677_v39  ;;  %v90_v36 = vld [vmem:[#allocation3 + $0x10] sm:$0xff] }
  0x25   :  { %v2660_v43 = vld [vmem:[#allocation5 + $0x380] sm:$0xf]  ;;  %v3369_v44 = vld [vmem:[#allocation5 + $0x38c] sm:$0xf0]  ;;  %v2533_v47 = vor.u32 %v3337_v42, %v2532_v41  ;;  %1295 = vmatpush.bf16.msra.mxu0 %v2277_v45  ;;  %v88_v41 = vld [vmem:[#allocation3] sm:$0xff] }
  0x26   :  { %v2260_v48 = vld [vmem:[#allocation5 + $0x60] sm:$0xf]  ;;  %v3269_v49 = vld [vmem:[#allocation5 + $0x6c] sm:$0xf0]  ;;  %v2661_v51 = vor.u32 %v3369_v44, %v2660_v43  ;;  %1308 = vmatpush.bf16.msra.mxu1 %v2405_v46  ;;  %v3315_v44 = vld [vmem:[#allocation5 + $0x1e4] sm:$0xf] }
  0x27   :  { %v2388_v50 = vld [vmem:[#allocation5 + $0x160] sm:$0xf]  ;;  %v3301_v52 = vld [vmem:[#allocation5 + $0x16c] sm:$0xf0]  ;;  %v2261_v57 = vor.u32 %v3269_v49, %v2260_v48  ;;  %1321 = vmatpush.bf16.msra.mxu2 %v2533_v47  ;;  %v2454_v45 = vld [vmem:[#allocation5 + $0x1f0] sm:$0xf0]  ;;  %v2329_v48 = vor.u32 %v3283_v34, %v2326_v35 }
  0x28   :  { %v2516_v53 = vld [vmem:[#allocation5 + $0x260] sm:$0xf]  ;;  %v3333_v54 = vld [vmem:[#allocation5 + $0x26c] sm:$0xf0]  ;;  %v2389_v58 = vor.u32 %v3301_v52, %v2388_v50  ;;  %1334 = vmatpush.bf16.msra.mxu3 %v2661_v51  ;;  %v3693_v52 = vpack.c.bf16 %v90_v36, %v90_v36  ;;  %v3299_v36 = vld [vmem:[#allocation5 + $0x164] sm:$0xf] }
  0x29   :  { %v2644_v55 = vld [vmem:[#allocation5 + $0x360] sm:$0xf]  ;;  %v3365_v56 = vld [vmem:[#allocation5 + $0x36c] sm:$0xf0]  ;;  %v2517_v59 = vor.u32 %v3333_v54, %v2516_v53  ;;  %1296 = vmatpush.bf16.msra.mxu0 %v2261_v57  ;;  %v3279_v54 = vld [vmem:[#allocation5 + $0xc4] sm:$0xf] }
  0x2a   :  { %v2244_v60 = vld [vmem:[#allocation5 + $0x40] sm:$0xf]  ;;  %v3265_v61 = vld [vmem:[#allocation5 + $0x4c] sm:$0xf0]  ;;  %v2645_v63 = vor.u32 %v3365_v56, %v2644_v55  ;;  %1309 = vmatpush.bf16.msra.mxu1 %v2389_v58  ;;  %v2310_v55 = vld [vmem:[#allocation5 + $0xd0] sm:$0xf0]  ;;  %v3695_v56 = vpack.c.bf16 %v88_v41, %v88_v41 }
  0x2b   :  { %v2372_v62 = vld [vmem:[#allocation5 + $0x140] sm:$0xf]  ;;  %v3297_v0 = vld [vmem:[#allocation5 + $0x14c] sm:$0xf0]  ;;  %v2245_v5 = vor.u32 %v3265_v61, %v2244_v60  ;;  %1322 = vmatpush.bf16.msra.mxu2 %v2517_v59  ;;  %v2457_v60 = vor.u32 %v3315_v44, %v2454_v45  ;;  %v3263_v44 = vld [vmem:[#allocation5 + $0x44] sm:$0xf] }
  0x2c   :  { %v2500_v1 = vld [vmem:[#allocation5 + $0x240] sm:$0xf]  ;;  %v3329_v2 = vld [vmem:[#allocation5 + $0x24c] sm:$0xf0]  ;;  %v2373_v6 = vor.u32 %v3297_v0, %v2372_v62  ;;  %1335 = vmatpush.bf16.msra.mxu3 %v2645_v63  ;;  %v3311_v62 = vld [vmem:[#allocation5 + $0x1c4] sm:$0xf] }
  0x2d   :  { %v2628_v3 = vld [vmem:[#allocation5 + $0x340] sm:$0xf]  ;;  %v3361_v4 = vld [vmem:[#allocation5 + $0x34c] sm:$0xf0]  ;;  %v2501_v7 = vor.u32 %v3329_v2, %v2500_v1  ;;  %1297 = vmatpush.bf16.msra.mxu0 %v2245_v5  ;;  %v2438_v63 = vld [vmem:[#allocation5 + $0x1d0] sm:$0xf0]  ;;  %v2313_v1 = vor.u32 %v3279_v54, %v2310_v55 }
  0x2e   :  { %v2228_v8 = vld [vmem:[#allocation5 + $0x20] sm:$0xf]  ;;  %v3261_v9 = vld [vmem:[#allocation5 + $0x2c] sm:$0xf0]  ;;  %v2629_v11 = vor.u32 %v3361_v4, %v2628_v3  ;;  %1310 = vmatpush.bf16.msra.mxu1 %v2373_v6  ;;  %v3275_v6 = vld [vmem:[#allocation5 + $0xa4] sm:$0xf] }
  0x2f   :  { %v2356_v10 = vld [vmem:[#allocation5 + $0x120] sm:$0xf]  ;;  %v3293_v12 = vld [vmem:[#allocation5 + $0x12c] sm:$0xf0]  ;;  %v2229_v17 = vor.u32 %v3261_v9, %v2228_v8  ;;  %1323 = vmatpush.bf16.msra.mxu2 %v2501_v7  ;;  %v2294_v7 = vld [vmem:[#allocation5 + $0xb0] sm:$0xf0]  ;;  %v2441_v9 = vor.u32 %v3311_v62, %v2438_v63 }
  0x30   :  { %v2484_v13 = vld [vmem:[#allocation5 + $0x220] sm:$0xf]  ;;  %v3325_v14 = vld [vmem:[#allocation5 + $0x22c] sm:$0xf0]  ;;  %v2357_v21 = vor.u32 %v3293_v12, %v2356_v10  ;;  %1336 = vmatpush.bf16.msra.mxu3 %v2629_v11  ;;  %v3307_v11 = vld [vmem:[#allocation5 + $0x1a4] sm:$0xf] }
  0x31   :  { %v2612_v15 = vld [vmem:[#allocation5 + $0x320] sm:$0xf]  ;;  %v3357_v16 = vld [vmem:[#allocation5 + $0x32c] sm:$0xf0]  ;;  %v2485_v22 = vor.u32 %v3325_v14, %v2484_v13  ;;  %1298 = vmatpush.bf16.msra.mxu0 %v2229_v17  ;;  %v2422_v12 = vld [vmem:[#allocation5 + $0x1b0] sm:$0xf0]  ;;  %v2297_v14 = vor.u32 %v3275_v6, %v2294_v7 }
  0x32   :  { %v2212_v18 = vld [vmem:[#allocation5] sm:$0xf]  ;;  %v3257_v19 = vld [vmem:[#allocation5 + $0xc] sm:$0xf0]  ;;  %v2613_v26 = vor.u32 %v3357_v16, %v2612_v15  ;;  %1311 = vmatpush.bf16.msra.mxu1 %v2357_v21  ;;  %v2425_v21 = vor.u32 %v3307_v11, %v2422_v12  ;;  %v2246_v45 = vld [vmem:[#allocation5 + $0x50] sm:$0xf0] }
  0x33   :  { %v2340_v20 = vld [vmem:[#allocation5 + $0x100] sm:$0xf]  ;;  %v3289_v23 = vld [vmem:[#allocation5 + $0x10c] sm:$0xf0]  ;;  %v2213_v33 = vor.u32 %v3257_v19, %v2212_v18  ;;  %1324 = vmatpush.bf16.msra.mxu2 %v2485_v22  ;;  %v3271_v19 = vld [vmem:[#allocation5 + $0x84] sm:$0xf] }
  0x34   :  { %v2468_v24 = vld [vmem:[#allocation5 + $0x200] sm:$0xf]  ;;  %v3321_v25 = vld [vmem:[#allocation5 + $0x20c] sm:$0xf0]  ;;  %v2341_v37 = vor.u32 %v3289_v23, %v2340_v20  ;;  %1337 = vmatpush.bf16.msra.mxu3 %v2613_v26  ;;  %v2278_v20 = vld [vmem:[#allocation5 + $0x90] sm:$0xf0] }
  0x35   :  { %v2596_v27 = vld [vmem:[#allocation5 + $0x300] sm:$0xf]  ;;  %v3353_v28 = vld [vmem:[#allocation5 + $0x30c] sm:$0xf0]  ;;  %v2469_v38 = vor.u32 %v3321_v25, %v2468_v24  ;;  %1299 = vmatpush.bf16.msra.mxu0 %v2213_v33  ;;  %v3303_v23 = vld [vmem:[#allocation5 + $0x184] sm:$0xf]  ;;  %v2281_v26 = vor.u32 %v3271_v19, %v2278_v20 }
  0x36   :  { %v2836_v29 = vld [vmem:[#allocation5 + $0x4e0] sm:$0xf]  ;;  %v3413_v30 = vld [vmem:[#allocation5 + $0x4ec] sm:$0xf0]  ;;  %v2597_v42 = vor.u32 %v3353_v28, %v2596_v27  ;;  %1312 = vmatpush.bf16.msra.mxu1 %v2341_v37  ;;  %v2406_v24 = vld [vmem:[#allocation5 + $0x190] sm:$0xf0] }
  0x37   :  { %v2964_v31 = vld [vmem:[#allocation5 + $0x5e0] sm:$0xf]  ;;  %v3445_v32 = vld [vmem:[#allocation5 + $0x5ec] sm:$0xf0]  ;;  %v2837_v43 = vor.u32 %v3413_v30, %v2836_v29  ;;  %1325 = vmatpush.bf16.msra.mxu2 %v2469_v38  ;;  %v94_v33 = vld [vmem:[#allocation3 + $0x30] sm:$0xff]  ;;  %v2409_v34 = vor.u32 %v3303_v23, %v2406_v24 }
  0x38   :  { %v2980_v39 = vld [vmem:[#allocation5 + $0x600] sm:$0xf]  ;;  %v3449_v40 = vld [vmem:[#allocation5 + $0x60c] sm:$0xf0]  ;;  %v2965_v47 = vor.u32 %v3445_v32, %v2964_v31  ;;  %1338 = vmatpush.bf16.msra.mxu3 %v2597_v42  ;;  %1300 = vmatmul.bf16.vlgmr.msra.gmra.mxu0 %v3695_v56  ;;  %v3267_v31 = vld [vmem:[#allocation5 + $0x64] sm:$0xf] }
  0x39   :  { %v91_v46 = vld [vmem:[#allocation3 + $0x18] sm:$0xff]  ;;  %v3409_v50 = vld [vmem:[#allocation5 + $0x4cc] sm:$0xf0]  ;;  %v2981_v57 = vor.u32 %v3449_v40, %v2980_v39  ;;  %1344 = vmatpush.bf16.msrb.mxu0 %v2837_v43  ;;  %v2262_v32 = vld [vmem:[#allocation5 + $0x70] sm:$0xf0] }
  0x3a   :  { %v2820_v49 = vld [vmem:[#allocation5 + $0x4c0] sm:$0xf]  ;;  %v3441_v53 = vld [vmem:[#allocation5 + $0x5cc] sm:$0xf0]  ;;  %v3697_v58 = vpack.c.bf16 %v91_v46, %v91_v46  ;;  %1357 = vmatpush.bf16.msrb.mxu1 %v2965_v47  ;;  %1326 = vmatmul.bf16.vlgmr.msra.gmra.mxu2 %v3693_v52  ;;  %v2390_v37 = vld [vmem:[#allocation5 + $0x170] sm:$0xf0]  ;;  %v2265_v39 = vor.u32 %v3267_v31, %v2262_v32  ;;  %v3705_v46 = vpack.c.bf16 %v94_v33, %v94_v33 }
  0x3b   :  { %v2948_v51 = vld [vmem:[#allocation5 + $0x5c0] sm:$0xf]  ;;  %v89_v59 = vld [vmem:[#allocation3 + $0x8] sm:$0xff]  ;;  %v2821_v61 = vor.u32 %v3409_v50, %v2820_v49  ;;  %1377 = vmatpush.bf16.msrb.mxu2 %v2981_v57  ;;  %v2393_v47 = vor.u32 %v3299_v36, %v2390_v37  ;;  %v3295_v49 = vld [vmem:[#allocation5 + $0x144] sm:$0xf] }
  0x3c   :  { %1383 = vmatpush.bf16.msrb.mxu3 %v2329_v48  ;;  %v2949_v0 = vor.u32 %v3441_v53, %v2948_v51  ;;  %v2804_v2 = vld [vmem:[#allocation5 + $0x4a0] sm:$0xf]  ;;  %v3405_v3 = vld [vmem:[#allocation5 + $0x4ac] sm:$0xf0]  ;;  %v3701_v8 = vpack.c.bf16 %v89_v59, %v89_v59  ;;  %v2374_v50 = vld [vmem:[#allocation5 + $0x150] sm:$0xf0]  ;;  %v2249_v53 = vor.u32 %v3263_v44, %v2246_v45 }
  0x3d   :  { %v2932_v4 = vld [vmem:[#allocation5 + $0x5a0] sm:$0xf]  ;;  %v3437_v5 = vld [vmem:[#allocation5 + $0x5ac] sm:$0xf0]  ;;  %1339 = vmatmul.bf16.vlgmr.msra.gmra.mxu3 %v3697_v58  ;;  %1345 = vmatpush.bf16.msrb.mxu0 %v2821_v61  ;;  %v2805_v10 = vor.u32 %v3405_v3, %v2804_v2  ;;  %v2230_v61 = vld [vmem:[#allocation5 + $0x30] sm:$0xf0]  ;;  %v2377_v62 = vor.u32 %v3295_v49, %v2374_v50 }
  0x3e   :  { %1358 = vmatpush.bf16.msrb.mxu1 %v2949_v0  ;;  %v2933_v13 = vor.u32 %v3437_v5, %v2932_v4  ;;  %v2788_v15 = vld [vmem:[#allocation5 + $0x480] sm:$0xf]  ;;  %v3401_v16 = vld [vmem:[#allocation5 + $0x48c] sm:$0xf0]  ;;  %v3291_v0 = vld [vmem:[#allocation5 + $0x124] sm:$0xf] }
  0x3f   :  { %1396 = vmatpush.bf16.msra.mxu2 %v2457_v60  ;;  %v2916_v17 = vld [vmem:[#allocation5 + $0x580] sm:$0xf]  ;;  %1313 = vmatmul.bf16.vlgmr.msra.gmra.mxu1 %v3701_v8  ;;  %v3433_v18 = vld [vmem:[#allocation5 + $0x58c] sm:$0xf0]  ;;  %v2789_v22 = vor.u32 %v3401_v16, %v2788_v15  ;;  %v3259_v60 = vld [vmem:[#allocation5 + $0x24] sm:$0xf] }
  0x40   :  { %1384 = vmatpush.bf16.msrb.mxu3 %v2313_v1  ;;  %v2917_v25 = vor.u32 %v3433_v18, %v2916_v17  ;;  %v2772_v27 = vld [vmem:[#allocation5 + $0x460] sm:$0xf]  ;;  %v3397_v28 = vld [vmem:[#allocation5 + $0x46c] sm:$0xf0]  ;;  %v2358_v1 = vld [vmem:[#allocation5 + $0x130] sm:$0xf0]  ;;  %v2233_v4 = vor.u32 %v3259_v60, %v2230_v61 }
  0x41   :  { %1346 = vmatpush.bf16.msrb.mxu0 %v2805_v10  ;;  %v2900_v29 = vld [vmem:[#allocation5 + $0x560] sm:$0xf]  ;;  %v3429_v30 = vld [vmem:[#allocation5 + $0x56c] sm:$0xf0]  ;;  %v2773_v35 = vor.u32 %v3397_v28, %v2772_v27  ;;  %v2214_v10 = vld [vmem:[#allocation5 + $0x10] sm:$0xf0]  ;;  %v2361_v15 = vor.u32 %v3291_v0, %v2358_v1 }
  0x42   :  { %1359 = vmatpush.bf16.msrb.mxu1 %v2933_v13  ;;  %v2901_v38 = vor.u32 %v3429_v30, %v2900_v29  ;;  %v2756_v40 = vld [vmem:[#allocation5 + $0x440] sm:$0xf]  ;;  %v3393_v41 = vld [vmem:[#allocation5 + $0x44c] sm:$0xf0]  ;;  %v3347_v11 = vld [vmem:[#allocation5 + $0x2e4] sm:$0xf] }
  0x43   :  { %1397 = vmatpush.bf16.msra.mxu2 %v2441_v9  ;;  %v2884_v42 = vld [vmem:[#allocation5 + $0x540] sm:$0xf]  ;;  %v3425_v43 = vld [vmem:[#allocation5 + $0x54c] sm:$0xf0]  ;;  %v2757_v48 = vor.u32 %v3393_v41, %v2756_v40  ;;  %v3255_v9 = vld [vmem:[#allocation5 + $0x4] sm:$0xf] }
  0x44   :  { %1385 = vmatpush.bf16.msrb.mxu3 %v2297_v14  ;;  %v2885_v51 = vor.u32 %v3425_v43, %v2884_v42  ;;  %v2740_v54 = vld [vmem:[#allocation5 + $0x420] sm:$0xf]  ;;  %v3389_v55 = vld [vmem:[#allocation5 + $0x42c] sm:$0xf0]  ;;  %v2582_v12 = vld [vmem:[#allocation5 + $0x2f0] sm:$0xf0] }
  0x45   :  { %1347 = vmatpush.bf16.msrb.mxu0 %v2789_v22  ;;  %v2868_v57 = vld [vmem:[#allocation5 + $0x520] sm:$0xf]  ;;  %v3421_v59 = vld [vmem:[#allocation5 + $0x52c] sm:$0xf0]  ;;  %v2741_v63 = vor.u32 %v3389_v55, %v2740_v54  ;;  %v3379_v13 = vld [vmem:[#allocation5 + $0x3e4] sm:$0xf] }
  0x46   :  { %1360 = vmatpush.bf16.msrb.mxu1 %v2917_v25  ;;  %v2724_v2 = vld [vmem:[#allocation5 + $0x400] sm:$0xf]  ;;  %v2869_v3 = vor.u32 %v3421_v59, %v2868_v57  ;;  %v3385_v5 = vld [vmem:[#allocation5 + $0x40c] sm:$0xf0]  ;;  %v2710_v14 = vld [vmem:[#allocation5 + $0x3f0] sm:$0xf0]  ;;  %v2585_v25 = vor.u32 %v3347_v11, %v2582_v12 }
  0x47   :  { %1398 = vmatpush.bf16.msra.mxu2 %v2425_v21  ;;  %v2852_v6 = vld [vmem:[#allocation5 + $0x500] sm:$0xf]  ;;  %v3417_v7 = vld [vmem:[#allocation5 + $0x50c] sm:$0xf0]  ;;  %v2725_v16 = vor.u32 %v3385_v5, %v2724_v2  ;;  %v3411_v17 = vld [vmem:[#allocation5 + $0x4e4] sm:$0xf]  ;;  %v2217_v21 = vor.u32 %v3255_v9, %v2214_v10 }
  0x48   :  { %1386 = vmatpush.bf16.msrb.mxu3 %v2281_v26  ;;  %v2838_v18 = vld [vmem:[#allocation5 + $0x4f0] sm:$0xf0]  ;;  %v92_v19 = vld [vmem:[#allocation3 + $0x20] sm:$0xff]  ;;  %v2853_v20 = vor.u32 %v3417_v7, %v2852_v6  ;;  %v3287_v22 = vld [vmem:[#allocation5 + $0x104] sm:$0xf]  ;;  %v2713_v26 = vor.u32 %v3379_v13, %v2710_v14 }
  0x49   :  { %1348 = vmatpush.bf16.msrb.mxu0 %v2773_v35  ;;  %v2342_v23 = vld [vmem:[#allocation5 + $0x110] sm:$0xf0]  ;;  %v3443_v27 = vld [vmem:[#allocation5 + $0x5e4] sm:$0xf]  ;;  %v2841_v30 = vor.u32 %v3411_v17, %v2838_v18  ;;  %v3709_v31 = vpack.c.bf16 %v92_v19, %v92_v19 }
  0x4a   :  { %1361 = vmatpush.bf16.msrb.mxu1 %v2901_v38  ;;  %2994 = vmatmul.msk.bf16.vlgmr.msrb.gmra.mxu2 %vm1288_vm0, %v3705_v46  ;;  %v93_v24 = vld [vmem:[#allocation3 + $0x28] sm:$0xff]  ;;  %v3343_v29 = vld [vmem:[#allocation5 + $0x2c4] sm:$0xf]  ;;  %v2345_v35 = vor.u32 %v3287_v22, %v2342_v23 }
  0x4b   :  { %1399 = vmatpush.bf16.msra.mxu2 %v2409_v34  ;;  %v2966_v28 = vld [vmem:[#allocation5 + $0x5f0] sm:$0xf0]  ;;  %v3375_v33 = vld [vmem:[#allocation5 + $0x3c4] sm:$0xf]  ;;  %v3711_v36 = vpack.c.bf16 %v93_v24, %v93_v24 }
  0x4c   :  { %1387 = vmatpush.bf16.msrb.mxu3 %v2265_v39  ;;  %v2566_v32 = vld [vmem:[#allocation5 + $0x2d0] sm:$0xf0]  ;;  %v3407_v37 = vld [vmem:[#allocation5 + $0x4c4] sm:$0xf]  ;;  %v2969_v39 = vor.u32 %v3443_v27, %v2966_v28 }
  0x4d   :  { %1349 = vmatpush.bf16.msrb.mxu0 %v2757_v48  ;;  %v2694_v34 = vld [vmem:[#allocation5 + $0x3d0] sm:$0xf0]  ;;  %v2569_v40 = vor.u32 %v3343_v29, %v2566_v32  ;;  %v3439_v42 = vld [vmem:[#allocation5 + $0x5c4] sm:$0xf] }
  0x4e   :  { %1362 = vmatpush.bf16.msrb.mxu1 %v2885_v51  ;;  %v2822_v38 = vld [vmem:[#allocation5 + $0x4d0] sm:$0xf0]  ;;  %v2697_v41 = vor.u32 %v3375_v33, %v2694_v34  ;;  %v3339_v44 = vld [vmem:[#allocation5 + $0x2a4] sm:$0xf] }
  0x4f   :  { %1400 = vmatpush.bf16.msra.mxu2 %v2393_v47  ;;  %v2950_v43 = vld [vmem:[#allocation5 + $0x5d0] sm:$0xf0]  ;;  %v2825_v45 = vor.u32 %v3407_v37, %v2822_v38  ;;  %v3371_v48 = vld [vmem:[#allocation5 + $0x3a4] sm:$0xf] }
  0x50   :  { %1388 = vmatpush.bf16.msrb.mxu3 %v2249_v53  ;;  %v2550_v47 = vld [vmem:[#allocation5 + $0x2b0] sm:$0xf0]  ;;  %v3403_v50 = vld [vmem:[#allocation5 + $0x4a4] sm:$0xf]  ;;  %v2953_v53 = vor.u32 %v3439_v42, %v2950_v43 }
  0x51   :  { %1350 = vmatpush.bf16.msrb.mxu0 %v2741_v63  ;;  %v2678_v49 = vld [vmem:[#allocation5 + $0x3b0] sm:$0xf0]  ;;  %v2553_v54 = vor.u32 %v3339_v44, %v2550_v47  ;;  %v3435_v57 = vld [vmem:[#allocation5 + $0x5a4] sm:$0xf] }
  0x52   :  { %1363 = vmatpush.bf16.msrb.mxu1 %v2869_v3  ;;  %v2806_v51 = vld [vmem:[#allocation5 + $0x4b0] sm:$0xf0]  ;;  %v2681_v55 = vor.u32 %v3371_v48, %v2678_v49  ;;  %v3335_v60 = vld [vmem:[#allocation5 + $0x284] sm:$0xf] }
  0x53   :  { %1401 = vmatpush.bf16.msra.mxu2 %v2377_v62  ;;  %v2934_v59 = vld [vmem:[#allocation5 + $0x5b0] sm:$0xf0]  ;;  %v2809_v61 = vor.u32 %v3403_v50, %v2806_v51  ;;  %v3367_v63 = vld [vmem:[#allocation5 + $0x384] sm:$0xf] }
  0x54   :  { %1389 = vmatpush.bf16.msrb.mxu3 %v2233_v4  ;;  %v2534_v62 = vld [vmem:[#allocation5 + $0x290] sm:$0xf0]  ;;  %v3399_v1 = vld [vmem:[#allocation5 + $0x484] sm:$0xf]  ;;  %v2937_v3 = vor.u32 %v3435_v57, %v2934_v59  ;;  %v2332_v57 = vld [vmem:[#allocation5 + $0xe8] sm:$0xf] }
  0x55   :  { %1351 = vmatpush.bf16.msrb.mxu0 %v2725_v16  ;;  %v2662_v0 = vld [vmem:[#allocation5 + $0x390] sm:$0xf0]  ;;  %v2537_v4 = vor.u32 %v3335_v60, %v2534_v62  ;;  %v3431_v6 = vld [vmem:[#allocation5 + $0x584] sm:$0xf]  ;;  %v3286_v59 = vld [vmem:[#allocation5 + $0xf4] sm:$0xf0] }
  0x56   :  { %1364 = vmatpush.bf16.msrb.mxu1 %v2853_v20  ;;  %v2790_v2 = vld [vmem:[#allocation5 + $0x490] sm:$0xf0]  ;;  %v2665_v5 = vor.u32 %v3367_v63, %v2662_v0  ;;  %v3331_v9 = vld [vmem:[#allocation5 + $0x264] sm:$0xf]  ;;  %v2588_v63 = vld [vmem:[#allocation5 + $0x2e8] sm:$0xf] }
  0x57   :  { %1402 = vmatpush.bf16.msra.mxu2 %v2361_v15  ;;  %v2918_v7 = vld [vmem:[#allocation5 + $0x590] sm:$0xf0]  ;;  %v2793_v10 = vor.u32 %v3399_v1, %v2790_v2  ;;  %v3363_v12 = vld [vmem:[#allocation5 + $0x364] sm:$0xf]  ;;  %v3350_v0 = vld [vmem:[#allocation5 + $0x2f4] sm:$0xf0] }
  0x58   :  { %1390 = vmatpush.bf16.msrb.mxu3 %v2217_v21  ;;  %1352 = vmatmul.bf16.vlgmr.msrb.gmra.mxu0 %v3709_v31  ;;  %v2518_v11 = vld [vmem:[#allocation5 + $0x270] sm:$0xf0]  ;;  %v3395_v14 = vld [vmem:[#allocation5 + $0x464] sm:$0xf]  ;;  %v2921_v16 = vor.u32 %v3431_v6, %v2918_v7  ;;  %v2333_v6 = vor.u32 %v3286_v59, %v2332_v57  ;;  %v2716_v7 = vld [vmem:[#allocation5 + $0x3e8] sm:$0xf] }
  0x59   :  { %1409 = vmatpush.bf16.msra.mxu0 %v2585_v25  ;;  %1365 = vmatmul.bf16.vlgmr.msrb.gmra.mxu1 %v3711_v36  ;;  %v2646_v13 = vld [vmem:[#allocation5 + $0x370] sm:$0xf0]  ;;  %v2521_v17 = vor.u32 %v3331_v9, %v2518_v11  ;;  %v3427_v19 = vld [vmem:[#allocation5 + $0x564] sm:$0xf]  ;;  %v3382_v9 = vld [vmem:[#allocation5 + $0x3f4] sm:$0xf0] }
  0x5a   :  { %1422 = vmatpush.bf16.msra.mxu1 %v2713_v26  ;;  %v2774_v15 = vld [vmem:[#allocation5 + $0x470] sm:$0xf0]  ;;  %v2649_v18 = vor.u32 %v3363_v12, %v2646_v13  ;;  %v3327_v21 = vld [vmem:[#allocation5 + $0x244] sm:$0xf]  ;;  %v2460_v11 = vld [vmem:[#allocation5 + $0x1e8] sm:$0xf]  ;;  %v2589_v13 = vor.u32 %v3350_v0, %v2588_v63 }
  0x5b   :  { %1403 = vmatpush.bf16.msra.mxu2 %v2345_v35  ;;  %1391 = vmatmul.bf16.vlgmr.msrb.gmra.mxu3 %v3695_v56  ;;  %v2902_v20 = vld [vmem:[#allocation5 + $0x570] sm:$0xf0]  ;;  %v2777_v22 = vor.u32 %v3395_v14, %v2774_v15  ;;  %v3359_v24 = vld [vmem:[#allocation5 + $0x344] sm:$0xf]  ;;  %v3318_v12 = vld [vmem:[#allocation5 + $0x1f4] sm:$0xf0] }
  0x5c   :  { %1435 = vmatpush.bf16.msra.mxu3 %v2841_v30  ;;  %v2502_v23 = vld [vmem:[#allocation5 + $0x250] sm:$0xf0]  ;;  %v3391_v26 = vld [vmem:[#allocation5 + $0x444] sm:$0xf]  ;;  %v2905_v28 = vor.u32 %v3427_v19, %v2902_v20  ;;  %v2316_v15 = vld [vmem:[#allocation5 + $0xc8] sm:$0xf]  ;;  %v2461_v20 = vor.u32 %v3318_v12, %v2460_v11 }
  0x5d   :  { %1410 = vmatpush.bf16.msra.mxu0 %v2569_v40  ;;  %v2630_v25 = vld [vmem:[#allocation5 + $0x350] sm:$0xf0]  ;;  %v2505_v29 = vor.u32 %v3327_v21, %v2502_v23  ;;  %v3423_v32 = vld [vmem:[#allocation5 + $0x544] sm:$0xf]  ;;  %v3346_v19 = vld [vmem:[#allocation5 + $0x2d4] sm:$0xf0] }
  0x5e   :  { %1423 = vmatpush.bf16.msra.mxu1 %v2697_v41  ;;  %1404 = vmatmul.bf16.vlgmr.msra.gmra.mxu2 %v3701_v8  ;;  %v2758_v27 = vld [vmem:[#allocation5 + $0x450] sm:$0xf0]  ;;  %v2633_v30 = vor.u32 %v3359_v24, %v2630_v25  ;;  %v3323_v34 = vld [vmem:[#allocation5 + $0x224] sm:$0xf]  ;;  %v2700_v21 = vld [vmem:[#allocation5 + $0x3c8] sm:$0xf] }
  0x5f   :  { %1448 = vmatpush.bf16.msrb.mxu2 %v2969_v39  ;;  %v2886_v33 = vld [vmem:[#allocation5 + $0x550] sm:$0xf0]  ;;  %v2761_v35 = vor.u32 %v3391_v26, %v2758_v27  ;;  %v3355_v38 = vld [vmem:[#allocation5 + $0x324] sm:$0xf]  ;;  %v2444_v24 = vld [vmem:[#allocation5 + $0x1c8] sm:$0xf] }
  0x60   :  { %1436 = vmatpush.bf16.msra.mxu3 %v2825_v45  ;;  %v2486_v37 = vld [vmem:[#allocation5 + $0x230] sm:$0xf0]  ;;  %v3387_v40 = vld [vmem:[#allocation5 + $0x424] sm:$0xf]  ;;  %v2889_v42 = vor.u32 %v3423_v32, %v2886_v33  ;;  %v3314_v25 = vld [vmem:[#allocation5 + $0x1d4] sm:$0xf0] }
  0x61   :  { %1411 = vmatpush.bf16.msra.mxu0 %v2553_v54  ;;  %v2614_v39 = vld [vmem:[#allocation5 + $0x330] sm:$0xf0]  ;;  %v3419_v43 = vld [vmem:[#allocation5 + $0x524] sm:$0xf]  ;;  %v2489_v47 = vor.u32 %v3323_v34, %v2486_v37  ;;  %v2300_v27 = vld [vmem:[#allocation5 + $0xa8] sm:$0xf]  ;;  %v2445_v33 = vor.u32 %v3314_v25, %v2444_v24 }
  0x62   :  { %1424 = vmatpush.bf16.msra.mxu1 %v2681_v55  ;;  %v2742_v41 = vld [vmem:[#allocation5 + $0x430] sm:$0xf0]  ;;  %v3319_v45 = vld [vmem:[#allocation5 + $0x204] sm:$0xf]  ;;  %v2617_v48 = vor.u32 %v3355_v38, %v2614_v39  ;;  %v3342_v32 = vld [vmem:[#allocation5 + $0x2b4] sm:$0xf0] }
  0x63   :  { %1449 = vmatpush.bf16.msrb.mxu2 %v2953_v53  ;;  %v2870_v44 = vld [vmem:[#allocation5 + $0x530] sm:$0xf0]  ;;  %v3351_v50 = vld [vmem:[#allocation5 + $0x304] sm:$0xf]  ;;  %v2745_v53 = vor.u32 %v3387_v40, %v2742_v41  ;;  %v2684_v34 = vld [vmem:[#allocation5 + $0x3a8] sm:$0xf] }
  0x64   :  { %1437 = vmatpush.bf16.msra.mxu3 %v2809_v61  ;;  %v2470_v49 = vld [vmem:[#allocation5 + $0x210] sm:$0xf0]  ;;  %v3383_v54 = vld [vmem:[#allocation5 + $0x404] sm:$0xf]  ;;  %v2873_v61 = vor.u32 %v3419_v43, %v2870_v44  ;;  %v2428_v38 = vld [vmem:[#allocation5 + $0x1a8] sm:$0xf] }
  0x65   :  { %1412 = vmatpush.bf16.msra.mxu0 %v2537_v4  ;;  %v2598_v51 = vld [vmem:[#allocation5 + $0x310] sm:$0xf0]  ;;  %v3447_v60 = vld [vmem:[#allocation5 + $0x604] sm:$0xf]  ;;  %v2473_v1 = vor.u32 %v3319_v45, %v2470_v49  ;;  %v3310_v39 = vld [vmem:[#allocation5 + $0x1b4] sm:$0xf0] }
  0x66   :  { %1425 = vmatpush.bf16.msra.mxu1 %v2665_v5  ;;  %v2726_v55 = vld [vmem:[#allocation5 + $0x410] sm:$0xf0]  ;;  %v2601_v2 = vor.u32 %v3351_v50, %v2598_v51  ;;  %v2284_v41 = vld [vmem:[#allocation5 + $0x88] sm:$0xf]  ;;  %v3338_v45 = vld [vmem:[#allocation5 + $0x294] sm:$0xf0] }
  0x67   :  { %1450 = vmatpush.bf16.msrb.mxu2 %v2937_v3  ;;  %v2982_v62 = vld [vmem:[#allocation5 + $0x610] sm:$0xf0]  ;;  %v3415_v3 = vld [vmem:[#allocation5 + $0x504] sm:$0xf]  ;;  %v2729_v5 = vor.u32 %v3383_v54, %v2726_v55  ;;  %v2540_v44 = vld [vmem:[#allocation5 + $0x288] sm:$0xf] }
  0x68   :  { %1438 = vmatpush.bf16.msra.mxu3 %v2793_v10  ;;  %v2854_v4 = vld [vmem:[#allocation5 + $0x510] sm:$0xf0]  ;;  %v2985_v10 = vor.u32 %v3447_v60, %v2982_v62  ;;  %v3370_v49 = vld [vmem:[#allocation5 + $0x394] sm:$0xf0]  ;;  %v2412_v51 = vld [vmem:[#allocation5 + $0x188] sm:$0xf]  ;;  %v2541_v54 = vor.u32 %v3338_v45, %v2540_v44 }
  0x69   :  { %1413 = vmatpush.bf16.msra.mxu0 %v2521_v17  ;;  %v2857_v14 = vor.u32 %v3415_v3, %v2854_v4  ;;  %v2717_v17 = vor.u32 %v3382_v9, %v2716_v7  ;;  %v2268_v55 = vld [vmem:[#allocation5 + $0x68] sm:$0xf]  ;;  %v3270_v57 = vld [vmem:[#allocation5 + $0x74] sm:$0xf0] }
  0x6a   :  { %1426 = vmatpush.bf16.msra.mxu1 %v2649_v18  ;;  %v2572_v18 = vld [vmem:[#allocation5 + $0x2c8] sm:$0xf]  ;;  %v3366_v0 = vld [vmem:[#allocation5 + $0x374] sm:$0xf0] }
  0x6b   :  { %1451 = vmatpush.bf16.msrb.mxu2 %v2921_v16  ;;  %v3282_v16 = vld [vmem:[#allocation5 + $0xd4] sm:$0xf0]  ;;  %v2573_v26 = vor.u32 %v3346_v19, %v2572_v18  ;;  %v2524_v60 = vld [vmem:[#allocation5 + $0x268] sm:$0xf] }
  0x6c   :  { %1439 = vmatpush.bf16.msra.mxu3 %v2777_v22  ;;  %v3378_v22 = vld [vmem:[#allocation5 + $0x3d4] sm:$0xf0]  ;;  %v2317_v23 = vor.u32 %v3282_v16, %v2316_v15  ;;  %v2652_v63 = vld [vmem:[#allocation5 + $0x368] sm:$0xf] }
  0x6d   :  { %1414 = vmatpush.bf16.msra.mxu0 %v2505_v29  ;;  %v2701_v29 = vor.u32 %v3378_v22, %v2700_v21  ;;  %v3302_v3 = vld [vmem:[#allocation5 + $0x174] sm:$0xf0]  ;;  %v2653_v7 = vor.u32 %v3366_v0, %v2652_v63  ;;  %v2508_v9 = vld [vmem:[#allocation5 + $0x248] sm:$0xf] }
  0x6e   :  { %1427 = vmatpush.bf16.msra.mxu1 %v2633_v30  ;;  %v2556_v30 = vld [vmem:[#allocation5 + $0x2a8] sm:$0xf]  ;;  %v3298_v16 = vld [vmem:[#allocation5 + $0x154] sm:$0xf0] }
  0x6f   :  { %1452 = vmatpush.bf16.msrb.mxu2 %v2905_v28  ;;  %v3278_v28 = vld [vmem:[#allocation5 + $0xb4] sm:$0xf0]  ;;  %v2557_v40 = vor.u32 %v3342_v32, %v2556_v30  ;;  %v2636_v12 = vld [vmem:[#allocation5 + $0x348] sm:$0xf] }
  0x70   :  { %1440 = vmatpush.bf16.msra.mxu3 %v2761_v35  ;;  %v3374_v35 = vld [vmem:[#allocation5 + $0x3b4] sm:$0xf0]  ;;  %v2301_v37 = vor.u32 %v3278_v28, %v2300_v27  ;;  %v2380_v15 = vld [vmem:[#allocation5 + $0x148] sm:$0xf] }
  0x71   :  { %1415 = vmatpush.bf16.msra.mxu0 %v2489_v47  ;;  %v2685_v43 = vor.u32 %v3374_v35, %v2684_v34  ;;  %v2429_v47 = vor.u32 %v3310_v39, %v2428_v38  ;;  %v2236_v18 = vld [vmem:[#allocation5 + $0x28] sm:$0xf]  ;;  %v3262_v19 = vld [vmem:[#allocation5 + $0x34] sm:$0xf0] }
  0x72   :  { %1428 = vmatpush.bf16.msra.mxu1 %v2617_v48  ;;  %v2668_v48 = vld [vmem:[#allocation5 + $0x388] sm:$0xf]  ;;  %v3326_v22 = vld [vmem:[#allocation5 + $0x234] sm:$0xf0] }
  0x73   :  { %1453 = vmatpush.bf16.msrb.mxu2 %v2889_v42  ;;  %v3274_v42 = vld [vmem:[#allocation5 + $0x94] sm:$0xf0]  ;;  %v2669_v59 = vor.u32 %v3370_v49, %v2668_v48  ;;  %v2492_v21 = vld [vmem:[#allocation5 + $0x228] sm:$0xf]  ;;  %v3284_v48 = vld [vmem:[#allocation5 + $0xec] sm:$0xf] }
  0x74   :  { %1441 = vmatpush.bf16.msra.mxu3 %v2745_v53  ;;  %v2285_v50 = vor.u32 %v3274_v42, %v2284_v41  ;;  %v3306_v53 = vld [vmem:[#allocation5 + $0x194] sm:$0xf0]  ;;  %v2620_v24 = vld [vmem:[#allocation5 + $0x328] sm:$0xf]  ;;  %v2493_v30 = vor.u32 %v3326_v22, %v2492_v21  ;;  %v2334_v49 = vld [vmem:[#allocation5 + $0xf8] sm:$0xf0] }
  0x75   :  { %1416 = vmatpush.bf16.msra.mxu0 %v2473_v1  ;;  %v2413_v62 = vor.u32 %v3306_v53, %v2412_v51  ;;  %v2269_v1 = vor.u32 %v3270_v57, %v2268_v55  ;;  %v3358_v25 = vld [vmem:[#allocation5 + $0x334] sm:$0xf0]  ;;  %v2364_v27 = vld [vmem:[#allocation5 + $0x128] sm:$0xf]  ;;  %v2337_v0 = vor.u32 %v3284_v48, %v2334_v49 }
  0x76   :  { %1429 = vmatpush.bf16.msra.mxu1 %v2601_v2  ;;  %v2396_v2 = vld [vmem:[#allocation5 + $0x168] sm:$0xf]  ;;  %v3294_v28 = vld [vmem:[#allocation5 + $0x134] sm:$0xf0]  ;;  %v2621_v35 = vor.u32 %v3358_v25, %v2620_v24  ;;  %v2430_v24 = vld [vmem:[#allocation5 + $0x1b8] sm:$0xf0] }
  0x77   :  { %1454 = vmatpush.bf16.msrb.mxu2 %v2873_v61  ;;  %v3334_v61 = vld [vmem:[#allocation5 + $0x274] sm:$0xf0]  ;;  %v2397_v11 = vor.u32 %v3302_v3, %v2396_v2  ;;  %v2476_v38 = vld [vmem:[#allocation5 + $0x208] sm:$0xf]  ;;  %v2365_v41 = vor.u32 %v3294_v28, %v2364_v27  ;;  %v3280_v2 = vld [vmem:[#allocation5 + $0xcc] sm:$0xf] }
  0x78   :  { %1442 = vmatpush.bf16.msra.mxu3 %v2729_v5  ;;  %1417 = vmatmul.bf16.vlgmr.msra.gmra.mxu0 %v3693_v52  ;;  %v2525_v4 = vor.u32 %v3334_v61, %v2524_v60  ;;  %v2252_v5 = vld [vmem:[#allocation5 + $0x48] sm:$0xf]  ;;  %v3258_v32 = vld [vmem:[#allocation5 + $0x14] sm:$0xf0]  ;;  %v3316_v61 = vld [vmem:[#allocation5 + $0x1ec] sm:$0xf] }
  0x79   :  { %1500 = vmatpush.bf16.msrb.mxu0 %v2589_v13  ;;  %1430 = vmatmul.bf16.vlgmr.msra.gmra.mxu1 %v3697_v58  ;;  %v3362_v13 = vld [vmem:[#allocation5 + $0x354] sm:$0xf0]  ;;  %v2972_v53 = vld [vmem:[#allocation5 + $0x5e8] sm:$0xf]  ;;  %v2318_v3 = vld [vmem:[#allocation5 + $0xd8] sm:$0xf0] }
  0x7a   :  { %1474 = vmatpush.bf16.msrb.mxu1 %v2333_v6  ;;  %v3266_v6 = vld [vmem:[#allocation5 + $0x54] sm:$0xf0]  ;;  %v2828_v55 = vld [vmem:[#allocation5 + $0x4c8] sm:$0xf]  ;;  %v3272_v27 = vld [vmem:[#allocation5 + $0x8c] sm:$0xf] }
  0x7b   :  { %1455 = vmatpush.bf16.msrb.mxu2 %v2857_v14  ;;  %1443 = vmatmul.bf16.vlgmr.msra.gmra.mxu3 %v3709_v31  ;;  %v2253_v14 = vor.u32 %v3266_v6, %v2252_v5  ;;  %v3414_v34 = vld [vmem:[#allocation5 + $0x4f4] sm:$0xf0]  ;;  %v2956_v6 = vld [vmem:[#allocation5 + $0x5c8] sm:$0xf]  ;;  %v2286_v28 = vld [vmem:[#allocation5 + $0x98] sm:$0xf0] }
  0x7c   :  { %1468 = vmatpush.bf16.msrb.mxu3 %v2985_v10  ;;  %v3330_v10 = vld [vmem:[#allocation5 + $0x254] sm:$0xf0]  ;;  %v2796_v21 = vld [vmem:[#allocation5 + $0x488] sm:$0xf] }
  0x7d   :  { %1501 = vmatpush.bf16.msrb.mxu0 %v2573_v26  ;;  %v2237_v26 = vor.u32 %v3262_v19, %v2236_v18  ;;  %v3322_v39 = vld [vmem:[#allocation5 + $0x214] sm:$0xf0]  ;;  %v2940_v19 = vld [vmem:[#allocation5 + $0x5a8] sm:$0xf] }
  0x7e   :  { %1475 = vmatpush.bf16.msrb.mxu1 %v2317_v23  ;;  %1456 = vmatmul.bf16.vlgmr.msrb.gmra.mxu2 %v3711_v36  ;;  %v2381_v23 = vor.u32 %v3298_v16, %v2380_v15  ;;  %v3354_v42 = vld [vmem:[#allocation5 + $0x314] sm:$0xf0]  ;;  %v2477_v51 = vor.u32 %v3322_v39, %v2476_v38  ;;  %v3276_v15 = vld [vmem:[#allocation5 + $0xac] sm:$0xf]  ;;  %v2302_v16 = vld [vmem:[#allocation5 + $0xb8] sm:$0xf0]  ;;  %v2289_v39 = vor.u32 %v3272_v27, %v2286_v28 }
  0x7f   :  { %1513 = vmatpush.bf16.msra.mxu2 %v2717_v17  ;;  %v2509_v17 = vor.u32 %v3330_v10, %v2508_v9  ;;  %v3450_v44 = vld [vmem:[#allocation5 + $0x614] sm:$0xf0]  ;;  %v2812_v9 = vld [vmem:[#allocation5 + $0x4a8] sm:$0xf]  ;;  %v2305_v25 = vor.u32 %v3276_v15, %v2302_v16  ;;  %v2414_v38 = vld [vmem:[#allocation5 + $0x198] sm:$0xf0] }
  0x80   :  { %1487 = vmatpush.bf16.msra.mxu3 %v2461_v20  ;;  %v2637_v20 = vor.u32 %v3362_v13, %v2636_v12  ;;  %v3406_v10 = vld [vmem:[#allocation5 + $0x4b4] sm:$0xf0]  ;;  %v2446_v12 = vld [vmem:[#allocation5 + $0x1d8] sm:$0xf0]  ;;  %v2321_v13 = vor.u32 %v3280_v2, %v2318_v3  ;;  %v2764_v48 = vld [vmem:[#allocation5 + $0x448] sm:$0xf] }
  0x81   :  { %1502 = vmatpush.bf16.msrb.mxu0 %v2557_v40  ;;  %v2604_v40 = vld [vmem:[#allocation5 + $0x308] sm:$0xf]  ;;  %v3402_v22 = vld [vmem:[#allocation5 + $0x494] sm:$0xf0]  ;;  %v2382_v2 = vld [vmem:[#allocation5 + $0x158] sm:$0xf0] }
  0x82   :  { %1476 = vmatpush.bf16.msrb.mxu1 %v2301_v37  ;;  %v2348_v37 = vld [vmem:[#allocation5 + $0x108] sm:$0xf]  ;;  %v2605_v57 = vor.u32 %v3354_v42, %v2604_v40  ;;  %v2270_v42 = vld [vmem:[#allocation5 + $0x78] sm:$0xf0]  ;;  %v3394_v49 = vld [vmem:[#allocation5 + $0x454] sm:$0xf0] }
  0x83   :  { %1514 = vmatpush.bf16.msra.mxu2 %v2701_v29  ;;  %v2220_v29 = vld [vmem:[#allocation5 + $0x8] sm:$0xf]  ;;  %v2366_v15 = vld [vmem:[#allocation5 + $0x138] sm:$0xf0] }
  0x84   :  { %1488 = vmatpush.bf16.msra.mxu3 %v2445_v33  ;;  %v2844_v33 = vld [vmem:[#allocation5 + $0x4e8] sm:$0xf]  ;;  %v2221_v45 = vor.u32 %v3258_v32, %v2220_v29  ;;  %v2797_v29 = vor.u32 %v3402_v22, %v2796_v21  ;;  %v3256_v21 = vld [vmem:[#allocation5 + $0xc] sm:$0xf]  ;;  %v2222_v22 = vld [vmem:[#allocation5 + $0x18] sm:$0xf0] }
  0x85   :  { %1503 = vmatpush.bf16.msrb.mxu0 %v2541_v54  ;;  %v3446_v54 = vld [vmem:[#allocation5 + $0x5f4] sm:$0xf0]  ;;  %v2924_v32 = vld [vmem:[#allocation5 + $0x588] sm:$0xf]  ;;  %v2718_v27 = vld [vmem:[#allocation5 + $0x3f8] sm:$0xf0] }
  0x86   :  { %1477 = vmatpush.bf16.msrb.mxu1 %v2285_v50  ;;  %v2845_v50 = vor.u32 %v3414_v34, %v2844_v33  ;;  %v3434_v33 = vld [vmem:[#allocation5 + $0x594] sm:$0xf0]  ;;  %v2780_v34 = vld [vmem:[#allocation5 + $0x468] sm:$0xf] }
  0x87   :  { %1515 = vmatpush.bf16.msra.mxu2 %v2685_v43  ;;  %v2988_v43 = vld [vmem:[#allocation5 + $0x608] sm:$0xf]  ;;  %v2925_v40 = vor.u32 %v3434_v33, %v2924_v32  ;;  %v3344_v32 = vld [vmem:[#allocation5 + $0x2cc] sm:$0xf]  ;;  %v2225_v33 = vor.u32 %v3256_v21, %v2222_v22 }
  0x88   :  { %1489 = vmatpush.bf16.msra.mxu3 %v2429_v47  ;;  %v3290_v47 = vld [vmem:[#allocation5 + $0x114] sm:$0xf0]  ;;  %v2989_v60 = vor.u32 %v3450_v44, %v2988_v43  ;;  %v3364_v21 = vld [vmem:[#allocation5 + $0x36c] sm:$0xf] }
  0x89   :  { %1504 = vmatpush.bf16.msrb.mxu0 %v2525_v4  ;;  %v2349_v63 = vor.u32 %v3290_v47, %v2348_v37  ;;  %v3304_v37 = vld [vmem:[#allocation5 + $0x18c] sm:$0xf]  ;;  %v3430_v47 = vld [vmem:[#allocation5 + $0x574] sm:$0xf0] }
  0x8a   :  { %1478 = vmatpush.bf16.msrb.mxu1 %v2269_v1  ;;  %v2973_v1 = vor.u32 %v3446_v54, %v2972_v53  ;;  %v2417_v44 = vor.u32 %v3304_v37, %v2414_v38  ;;  %v2350_v37 = vld [vmem:[#allocation5 + $0x118] sm:$0xf0] }
  0x8b   :  { %1516 = vmatpush.bf16.msra.mxu2 %v2669_v59  ;;  %2995 = vmatmul.msk.bf16.vlgmr.msrb.gmra.mxu3 %vm1288_vm0, %v3705_v46  ;;  %v3410_v59 = vld [vmem:[#allocation5 + $0x4d4] sm:$0xf0] }
  0x8c   :  { %1490 = vmatpush.bf16.msra.mxu3 %v2413_v62  ;;  %v2462_v62 = vld [vmem:[#allocation5 + $0x1f8] sm:$0xf0]  ;;  %v2829_v4 = vor.u32 %v3410_v59, %v2828_v55  ;;  %v3264_v55 = vld [vmem:[#allocation5 + $0x4c] sm:$0xf]  ;;  %v2765_v59 = vor.u32 %v3394_v49, %v2764_v48 }
  0x8d   :  { %1505 = vmatpush.bf16.msrb.mxu0 %v2509_v17  ;;  %v2465_v5 = vor.u32 %v3316_v61, %v2462_v62  ;;  %v2813_v17 = vor.u32 %v3406_v10, %v2812_v9  ;;  %v2892_v61 = vld [vmem:[#allocation5 + $0x548] sm:$0xf]  ;;  %v3426_v62 = vld [vmem:[#allocation5 + $0x554] sm:$0xf0]  ;;  %v3408_v48 = vld [vmem:[#allocation5 + $0x4cc] sm:$0xf] }
  0x8e   :  { %1479 = vmatpush.bf16.msrb.mxu1 %v2253_v14  ;;  %v2876_v10 = vld [vmem:[#allocation5 + $0x528] sm:$0xf]  ;;  %v2830_v49 = vld [vmem:[#allocation5 + $0x4d8] sm:$0xf0] }
  0x8f   :  { %1517 = vmatpush.bf16.msra.mxu2 %v2653_v7  ;;  %v3442_v7 = vld [vmem:[#allocation5 + $0x5d4] sm:$0xf0] }
  0x90   :  { %1491 = vmatpush.bf16.msra.mxu3 %v2397_v11  ;;  %v3312_v11 = vld [vmem:[#allocation5 + $0x1cc] sm:$0xf]  ;;  %v2957_v14 = vor.u32 %v3442_v7, %v2956_v6  ;;  %v2238_v6 = vld [vmem:[#allocation5 + $0x38] sm:$0xf0] }
  0x91   :  { %1506 = vmatpush.bf16.msrb.mxu0 %v2493_v30  ;;  %v2449_v18 = vor.u32 %v3312_v11, %v2446_v12  ;;  %v3422_v11 = vld [vmem:[#allocation5 + $0x534] sm:$0xf0]  ;;  %v2732_v12 = vld [vmem:[#allocation5 + $0x408] sm:$0xf] }
  0x92   :  { %1480 = vmatpush.bf16.msrb.mxu1 %v2237_v26 }
  0x93   :  { %1518 = vmatpush.bf16.msra.mxu2 %v2637_v20  ;;  %v3438_v20 = vld [vmem:[#allocation5 + $0x5b4] sm:$0xf0] }
  0x94   :  { %1492 = vmatpush.bf16.msra.mxu3 %v2381_v23  ;;  %v3308_v23 = vld [vmem:[#allocation5 + $0x1ac] sm:$0xf]  ;;  %v2941_v26 = vor.u32 %v3438_v20, %v2940_v19  ;;  %v2877_v19 = vor.u32 %v3422_v11, %v2876_v10  ;;  %v2860_v20 = vld [vmem:[#allocation5 + $0x508] sm:$0xf]  ;;  %v2670_v11 = vld [vmem:[#allocation5 + $0x398] sm:$0xf0] }
  0x95   :  { %1507 = vmatpush.bf16.msrb.mxu0 %v2477_v51  ;;  %v2433_v30 = vor.u32 %v3308_v23, %v2430_v24  ;;  %v2398_v51 = vld [vmem:[#allocation5 + $0x178] sm:$0xf0] }
  0x96   :  { %1481 = vmatpush.bf16.msrb.mxu1 %v2221_v45  ;;  %v2908_v45 = vld [vmem:[#allocation5 + $0x568] sm:$0xf] }
  0x97   :  { %1519 = vmatpush.bf16.msra.mxu2 %v2621_v35  ;;  %v3398_v35 = vld [vmem:[#allocation5 + $0x474] sm:$0xf0]  ;;  %v2909_v54 = vor.u32 %v3430_v47, %v2908_v45  ;;  %v2702_v47 = vld [vmem:[#allocation5 + $0x3d8] sm:$0xf0] }
  0x98   :  { %1493 = vmatpush.bf16.msra.mxu3 %v2365_v41  ;;  %1508 = vmatmul.bf16.vlgmr.msrb.gmra.mxu0 %v3693_v52  ;;  %v3268_v41 = vld [vmem:[#allocation5 + $0x6c] sm:$0xf]  ;;  %v2781_v43 = vor.u32 %v3398_v35, %v2780_v34  ;;  %v2574_v34 = vld [vmem:[#allocation5 + $0x2d8] sm:$0xf0] }
  0x99   :  { %1559 = vmatpush.bf16.msra.mxu0 %v2989_v60  ;;  %1482 = vmatmul.bf16.vlgmr.msrb.gmra.mxu1 %v3695_v56  ;;  %v2273_v53 = vor.u32 %v3268_v41, %v2270_v42  ;;  %v3288_v35 = vld [vmem:[#allocation5 + $0x10c] sm:$0xf] }
  0x9a   :  { %1526 = vmatpush.bf16.msra.mxu1 %v2845_v50  ;;  %v3300_v50 = vld [vmem:[#allocation5 + $0x16c] sm:$0xf]  ;;  %v2353_v45 = vor.u32 %v3288_v35, %v2350_v37 }
  0x9b   :  { %1520 = vmatpush.bf16.msra.mxu2 %v2605_v57  ;;  %v2254_v57 = vld [vmem:[#allocation5 + $0x58] sm:$0xf0]  ;;  %v2401_v60 = vor.u32 %v3300_v50, %v2398_v51  ;;  %v3340_v51 = vld [vmem:[#allocation5 + $0x2ac] sm:$0xf] }
  0x9c   :  { %1494 = vmatpush.bf16.msra.mxu3 %v2349_v63  ;;  %v2748_v63 = vld [vmem:[#allocation5 + $0x428] sm:$0xf]  ;;  %v2257_v3 = vor.u32 %v3264_v55, %v2254_v57  ;;  %v2958_v55 = vld [vmem:[#allocation5 + $0x5d8] sm:$0xf0]  ;;  %v3360_v35 = vld [vmem:[#allocation5 + $0x34c] sm:$0xf] }
  0x9d   :  { %1578 = vmatpush.bf16.msrb.mxu0 %v2465_v5  ;;  %v3260_v5 = vld [vmem:[#allocation5 + $0x2c] sm:$0xf] }
  0x9e   :  { %1527 = vmatpush.bf16.msra.mxu1 %v2829_v4  ;;  %1521 = vmatmul.bf16.vlgmr.msra.gmra.mxu2 %v3697_v58  ;;  %v2893_v4 = vor.u32 %v3426_v62, %v2892_v61  ;;  %v2241_v16 = vor.u32 %v3260_v5, %v2238_v6  ;;  %v2686_v62 = vld [vmem:[#allocation5 + $0x3b8] sm:$0xf0] }
  0x9f   :  { %1565 = vmatpush.bf16.msrb.mxu2 %v2337_v0  ;;  %1495 = vmatmul.bf16.vlgmr.msra.gmra.mxu3 %v3701_v8  ;;  %v3390_v0 = vld [vmem:[#allocation5 + $0x434] sm:$0xf0]  ;;  %v2942_v5 = vld [vmem:[#allocation5 + $0x5b8] sm:$0xf0] }
  0xa0   :  { %1539 = vmatpush.bf16.msrb.mxu3 %v2973_v1  ;;  %v3296_v1 = vld [vmem:[#allocation5 + $0x14c] sm:$0xf]  ;;  %v2749_v7 = vor.u32 %v3390_v0, %v2748_v63  ;;  %v2814_v0 = vld [vmem:[#allocation5 + $0x4b8] sm:$0xf0] }
  0xa1   :  { %1579 = vmatpush.bf16.msrb.mxu0 %v2449_v18  ;;  %v2385_v9 = vor.u32 %v3296_v1, %v2382_v2  ;;  %v2590_v18 = vld [vmem:[#allocation5 + $0x2f8] sm:$0xf0]  ;;  %v3404_v63 = vld [vmem:[#allocation5 + $0x4ac] sm:$0xf] }
  0xa2   :  { %1528 = vmatpush.bf16.msra.mxu1 %v2813_v17  ;;  %v3348_v17 = vld [vmem:[#allocation5 + $0x2ec] sm:$0xf] }
  0xa3   :  { %1566 = vmatpush.bf16.msrb.mxu2 %v2321_v13  ;;  %v3386_v13 = vld [vmem:[#allocation5 + $0x414] sm:$0xf0]  ;;  %v2593_v28 = vor.u32 %v3348_v17, %v2590_v18  ;;  %v3336_v2 = vld [vmem:[#allocation5 + $0x28c] sm:$0xf]  ;;  %v2926_v18 = vld [vmem:[#allocation5 + $0x598] sm:$0xf0] }
  0xa4   :  { %1540 = vmatpush.bf16.msrb.mxu3 %v2957_v14  ;;  %v3292_v14 = vld [vmem:[#allocation5 + $0x12c] sm:$0xf]  ;;  %v2733_v23 = vor.u32 %v3386_v13, %v2732_v12  ;;  %v2798_v13 = vld [vmem:[#allocation5 + $0x498] sm:$0xf0] }
  0xa5   :  { %1580 = vmatpush.bf16.msrb.mxu0 %v2433_v30  ;;  %v2369_v24 = vor.u32 %v3292_v14, %v2366_v15  ;;  %v2846_v30 = vld [vmem:[#allocation5 + $0x4f8] sm:$0xf0]  ;;  %v3400_v12 = vld [vmem:[#allocation5 + $0x48c] sm:$0xf] }
  0xa6   :  { %1529 = vmatpush.bf16.msra.mxu1 %v2797_v29  ;;  %v3412_v29 = vld [vmem:[#allocation5 + $0x4ec] sm:$0xf] }
  0xa7   :  { %1567 = vmatpush.bf16.msrb.mxu2 %v2305_v25  ;;  %v3418_v25 = vld [vmem:[#allocation5 + $0x514] sm:$0xf0]  ;;  %v2849_v42 = vor.u32 %v3412_v29, %v2846_v30  ;;  %v3332_v15 = vld [vmem:[#allocation5 + $0x26c] sm:$0xf]  ;;  %v2910_v30 = vld [vmem:[#allocation5 + $0x578] sm:$0xf0] }
  0xa8   :  { %1541 = vmatpush.bf16.msrb.mxu3 %v2941_v26  ;;  %2996 = vmatmul.msk.bf16.vlgmr.msra.gmra.mxu0 %vm1288_vm0, %v3705_v46  ;;  %v3380_v26 = vld [vmem:[#allocation5 + $0x3ec] sm:$0xf]  ;;  %v2861_v38 = vor.u32 %v3418_v25, %v2860_v20  ;;  %v2801_v20 = vor.u32 %v3400_v12, %v2798_v13  ;;  %v2782_v25 = vld [vmem:[#allocation5 + $0x478] sm:$0xf0] }
  0xa9   :  { %1581 = vmatpush.bf16.msrb.mxu0 %v2417_v44  ;;  %v2721_v41 = vor.u32 %v3380_v26, %v2718_v27  ;;  %v2577_v44 = vor.u32 %v3344_v32, %v2574_v34  ;;  %v3328_v27 = vld [vmem:[#allocation5 + $0x24c] sm:$0xf]  ;;  %v2734_v13 = vld [vmem:[#allocation5 + $0x418] sm:$0xf0] }
  0xaa   :  { %1530 = vmatpush.bf16.msra.mxu1 %v2781_v43  ;;  %v3376_v43 = vld [vmem:[#allocation5 + $0x3cc] sm:$0xf] }
  0xab   :  { %1568 = vmatpush.bf16.msrb.mxu2 %v2289_v39  ;;  %v3444_v39 = vld [vmem:[#allocation5 + $0x5ec] sm:$0xf]  ;;  %v2705_v57 = vor.u32 %v3376_v43, %v2702_v47 }
  0xac   :  { %1542 = vmatpush.bf16.msrb.mxu3 %v2925_v40  ;;  %v2974_v40 = vld [vmem:[#allocation5 + $0x5f8] sm:$0xf0]  ;;  %v3428_v29 = vld [vmem:[#allocation5 + $0x56c] sm:$0xf] }
  0xad   :  { %1582 = vmatpush.bf16.msrb.mxu0 %v2401_v60  ;;  %v2977_v50 = vor.u32 %v3444_v39, %v2974_v40  ;;  %v3372_v60 = vld [vmem:[#allocation5 + $0x3ac] sm:$0xf]  ;;  %v2638_v39 = vld [vmem:[#allocation5 + $0x358] sm:$0xf0] }
  0xae   :  { %1531 = vmatpush.bf16.msra.mxu1 %v2765_v59  ;;  %v2833_v59 = vor.u32 %v3408_v48, %v2830_v49  ;;  %v2689_v6 = vor.u32 %v3372_v60, %v2686_v62  ;;  %v3392_v40 = vld [vmem:[#allocation5 + $0x44c] sm:$0xf]  ;;  %v2894_v48 = vld [vmem:[#allocation5 + $0x558] sm:$0xf0]  ;;  %v3741_v49 = vld [vmem:[#allocation7] sm:$0xf] }
  0xaf   :  { %1569 = vmatpush.bf16.msrb.mxu2 %v2273_v53  ;;  %v2558_v53 = vld [vmem:[#allocation5 + $0x2b8] sm:$0xf0]  ;;  %v3324_v43 = vld [vmem:[#allocation5 + $0x22c] sm:$0xf] }
  0xb0   :  { %1543 = vmatpush.bf16.msrb.mxu3 %v2909_v54  ;;  %v3440_v54 = vld [vmem:[#allocation5 + $0x5cc] sm:$0xf]  ;;  %v2561_v61 = vor.u32 %v3340_v51, %v2558_v53  ;;  %v2478_v62 = vld [vmem:[#allocation5 + $0x218] sm:$0xf0] }
  0xb1   :  { %1583 = vmatpush.bf16.msrb.mxu0 %v2385_v9  ;;  %v2961_v1 = vor.u32 %v3440_v54, %v2958_v55  ;;  %v3368_v9 = vld [vmem:[#allocation5 + $0x38c] sm:$0xf]  ;;  %v2622_v55 = vld [vmem:[#allocation5 + $0x338] sm:$0xf0] }
  0xb2   :  { %1532 = vmatpush.bf16.msra.mxu1 %v2749_v7  ;;  %v2817_v7 = vor.u32 %v3404_v63, %v2814_v0  ;;  %v3424_v47 = vld [vmem:[#allocation5 + $0x54c] sm:$0xf] }
  0xb3   :  { %1570 = vmatpush.bf16.msrb.mxu2 %v2257_v3  ;;  %v2542_v3 = vld [vmem:[#allocation5 + $0x298] sm:$0xf0]  ;;  %v3356_v53 = vld [vmem:[#allocation5 + $0x32c] sm:$0xf]  ;;  %v2897_v60 = vor.u32 %v3424_v47, %v2894_v48 }
  0xb4   :  { %1544 = vmatpush.bf16.msrb.mxu3 %v2893_v4  ;;  %v3436_v4 = vld [vmem:[#allocation5 + $0x5ac] sm:$0xf]  ;;  %v2545_v10 = vor.u32 %v3336_v2, %v2542_v3  ;;  %v2990_v3 = vld [vmem:[#allocation5 + $0x618] sm:$0xf0] }
  0xb5   :  { %1584 = vmatpush.bf16.msrb.mxu0 %v2369_v24  ;;  %v2945_v14 = vor.u32 %v3436_v4, %v2942_v5  ;;  %v3733_v17 = vpop.f32.mrf.mxu0  ;;  %v3396_v24 = vld [vmem:[#allocation5 + $0x46c] sm:$0xf]  ;;  %v300_v4 = vperm.slane %v3741_v49, 0 }
  0xb6   :  { %1533 = vmatpush.bf16.msra.mxu1 %v2733_v23  ;;  %v2654_v23 = vld [vmem:[#allocation5 + $0x378] sm:$0xf0]  ;;  %v2785_v34 = vor.u32 %v3396_v24, %v2782_v25  ;;  %v3420_v63 = vld [vmem:[#allocation5 + $0x52c] sm:$0xf] }
  0xb7   :  { %1571 = vmatpush.bf16.msrb.mxu2 %v2241_v16  ;;  %v2526_v16 = vld [vmem:[#allocation5 + $0x278] sm:$0xf0]  ;;  %v3448_v2 = vld [vmem:[#allocation5 + $0x60c] sm:$0xf] }
  0xb8   :  { %1545 = vmatpush.bf16.msrb.mxu3 %v2877_v19  ;;  %v2673_v19 = vor.u32 %v3368_v9, %v2670_v11  ;;  %v2529_v22 = vor.u32 %v3332_v15, %v2526_v16  ;;  %v3352_v9 = vld [vmem:[#allocation5 + $0x30c] sm:$0xf]  ;;  %v2606_v11 = vld [vmem:[#allocation5 + $0x318] sm:$0xf0]  ;;  %v2993_v16 = vor.u32 %v3448_v2, %v2990_v3  ;;  %v3080_v3 = vld [vmem:[#allocation8 + $0xa0] sm:$0xf] }
  0xb9   :  { %1534 = vmatmul.bf16.vlgmr.msra.gmra.mxu1 %v3709_v31  ;;  %1585 = vmatpush.bf16.msrb.mxu0 %v2353_v45  ;;  %v3384_v12 = vld [vmem:[#allocation5 + $0x40c] sm:$0xf]  ;;  %v2609_v24 = vor.u32 %v3352_v9, %v2606_v11  ;;  %v3454_v11 = vld [vmem:[#allocation8 + $0x14] sm:$0xf0] }
  0xba   :  { %1591 = vmatpush.bf16.msrb.mxu1 %v2593_v28  ;;  %v2510_v28 = vld [vmem:[#allocation5 + $0x258] sm:$0xf0]  ;;  %v2737_v25 = vor.u32 %v3384_v12, %v2734_v13  ;;  %v3072_v13 = vld [vmem:[#allocation8 + $0x90] sm:$0xf] }
  0xbb   :  { %1572 = vmatpush.bf16.msrb.mxu2 %v2225_v33  ;;  %v2657_v33 = vor.u32 %v3364_v21, %v2654_v23  ;;  %v2513_v37 = vor.u32 %v3328_v27, %v2510_v28  ;;  %v3120_v21 = vld [vmem:[#allocation8 + $0xf0] sm:$0xf]  ;;  %v1302_v23 = vadd.f32 %v3733_v17, %v300_v4  ;;  %v3048_v28 = vld [vmem:[#allocation8 + $0x60] sm:$0xf]  ;;  %v3472_v4 = vld [vmem:[#allocation8 + $0xa4] sm:$0xf0] }
  0xbc   :  { %1546 = vmatpush.bf16.msrb.mxu3 %v2861_v38  ;;  %1586 = vmatmul.bf16.vlgmr.msrb.gmra.mxu0 %v3701_v8  ;;  %v3735_v26 = vpop.f32.mrf.mxu1  ;;  %v3081_v12 = vor.u32 %v3472_v4, %v3080_v3  ;;  %v3455_v4 = vld [vmem:[#allocation8 + $0x24] sm:$0xf] }
  0xbd   :  { %1630 = vmatpush.bf16.msra.mxu0 %v2977_v50  ;;  %v3737_v32 = vpop.f32.mrf.mxu2  ;;  %v1303_v45 = vpop.f32.mrf.mxu0  ;;  %v2641_v50 = vor.u32 %v3360_v35, %v2638_v39  ;;  %v1315_v35 = vadd.f32 %v3735_v26, %v1302_v23  ;;  %v3040_v39 = vld [vmem:[#allocation8 + $0x50] sm:$0xf]  ;;  %v3032_v26 = vld [vmem:[#allocation8 + $0x40] sm:$0xf]  ;;  %v3468_v23 = vld [vmem:[#allocation8 + $0x84] sm:$0xf0] }
  0xbe   :  { %1592 = vmatpush.bf16.msrb.mxu1 %v2577_v44  ;;  %1573 = vmatmul.bf16.vlgmr.msrb.gmra.mxu2 %v3695_v56  ;;  %v3432_v56 = vld [vmem:[#allocation5 + $0x58c] sm:$0xf]  ;;  %v2494_v44 = vld [vmem:[#allocation5 + $0x238] sm:$0xf0] }
  0xbf   :  { %1617 = vmatpush.bf16.msra.mxu2 %v2849_v42  ;;  %1547 = vmatmul.bf16.vlgmr.msrb.gmra.mxu3 %v3711_v36  ;;  %v2929_v8 = vor.u32 %v3432_v56, %v2926_v18  ;;  %v2913_v42 = vor.u32 %v3428_v29, %v2910_v30  ;;  %v2497_v54 = vor.u32 %v3324_v43, %v2494_v44  ;;  %v3056_v56 = vld [vmem:[#allocation8 + $0x70] sm:$0xf]  ;;  %v3466_v18 = vld [vmem:[#allocation8 + $0x74] sm:$0xf0]  ;;  %v3464_v29 = vld [vmem:[#allocation8 + $0x64] sm:$0xf0] }
  0xc0   :  { %1604 = vmatpush.bf16.msra.mxu3 %v2721_v41  ;;  %v3739_v38 = vpop.f32.mrf.mxu3  ;;  %v2766_v41 = vld [vmem:[#allocation5 + $0x458] sm:$0xf0]  ;;  %v1328_v44 = vadd.f32 %v3737_v32, %v1315_v35  ;;  %v3460_v45 = vld [vmem:[#allocation8 + $0x44] sm:$0xf0] }
  0xc1   :  { %1631 = vmatpush.bf16.msra.mxu0 %v2961_v1  ;;  %v2769_v51 = vor.u32 %v3392_v40, %v2766_v41  ;;  %v2878_v1 = vld [vmem:[#allocation5 + $0x538] sm:$0xf0] }
  0xc2   :  { %1593 = vmatpush.bf16.msrb.mxu1 %v2561_v61  ;;  %v3320_v61 = vld [vmem:[#allocation5 + $0x20c] sm:$0xf]  ;;  %v2881_v15 = vor.u32 %v3420_v63, %v2878_v1  ;;  %v3462_v40 = vld [vmem:[#allocation8 + $0x54] sm:$0xf0]  ;;  %v3016_v63 = vld [vmem:[#allocation8 + $0x20] sm:$0xf] }
  0xc3   :  { %1618 = vmatpush.bf16.msra.mxu2 %v2833_v59  ;;  %v2750_v59 = vld [vmem:[#allocation5 + $0x438] sm:$0xf0] }
  0xc4   :  { %1605 = vmatpush.bf16.msra.mxu3 %v2705_v57  ;;  %v3388_v57 = vld [vmem:[#allocation5 + $0x42c] sm:$0xf]  ;;  %v1316_v0 = vpop.f32.mrf.mxu1  ;;  %v3478_v43 = vld [vmem:[#allocation8 + $0xd4] sm:$0xf0] }
  0xc5   :  { %1632 = vmatpush.bf16.msra.mxu0 %v2945_v14  ;;  %v1329_v5 = vpop.f32.mrf.mxu2  ;;  %v3456_v0 = vld [vmem:[#allocation8 + $0x24] sm:$0xf0] }
  0xc6   :  { %1594 = vmatpush.bf16.msrb.mxu1 %v2545_v10  ;;  %v2481_v10 = vor.u32 %v3320_v61, %v2478_v62 }
  0xc7   :  { %1619 = vmatpush.bf16.msra.mxu2 %v2817_v7  ;;  %v2753_v7 = vor.u32 %v3388_v57, %v2750_v59  ;;  %v3024_v57 = vld [vmem:[#allocation8 + $0x30] sm:$0xf] }
  0xc8   :  { %1606 = vmatpush.bf16.msra.mxu3 %v2689_v6  ;;  %v2625_v6 = vor.u32 %v3356_v53, %v2622_v55  ;;  %v1342_v14 = vpop.f32.mrf.mxu3  ;;  %v1341_v53 = vadd.f32 %v3739_v38, %v1328_v44  ;;  %v3033_v55 = vor.u32 %v3460_v45, %v3032_v26  ;;  %v3477_v44 = vld [vmem:[#allocation8 + $0xd4] sm:$0xf]  ;;  %v3459_v45 = vld [vmem:[#allocation8 + $0x44] sm:$0xf] }
  0xc9   :  { %1633 = vmatpush.bf16.msra.mxu0 %v2929_v8  ;;  %v3057_v8 = vor.u32 %v3466_v18, %v3056_v56  ;;  %v3470_v14 = vld [vmem:[#allocation8 + $0x94] sm:$0xf0]  ;;  %v3452_v18 = vld [vmem:[#allocation8 + $0x4] sm:$0xf0] }
  0xca   :  { %1595 = vmatpush.bf16.msrb.mxu1 %v2529_v22  ;;  %v3482_v22 = vld [vmem:[#allocation8 + $0xf4] sm:$0xf0] }
  0xcb   :  { %1620 = vmatpush.bf16.msra.mxu2 %v2801_v20  ;;  %v2862_v20 = vld [vmem:[#allocation5 + $0x518] sm:$0xf0]  ;;  %v3121_v30 = vor.u32 %v3482_v22, %v3120_v21  ;;  %v3058_v21 = vld [vmem:[#allocation8 + $0x78] sm:$0xf0]  ;;  %v3064_v22 = vld [vmem:[#allocation8 + $0x80] sm:$0xf] }
  0xcc   :  { %1607 = vmatpush.bf16.msra.mxu3 %v2673_v19  ;;  %v3416_v19 = vld [vmem:[#allocation5 + $0x50c] sm:$0xf] }
  0xcd   :  { %1634 = vmatpush.bf16.msra.mxu0 %v2913_v42  ;;  %v2865_v27 = vor.u32 %v3416_v19, %v2862_v20  ;;  %v1379_v17 = vpop.f32.mrf.mxu2  ;;  %v3104_v42 = vld [vmem:[#allocation8 + $0xd0] sm:$0xf]  ;;  %v3465_v19 = vld [vmem:[#allocation8 + $0x74] sm:$0xf] }
  0xce   :  { %1596 = vmatpush.bf16.msrb.mxu1 %v2513_v37  ;;  %v3049_v37 = vor.u32 %v3464_v29, %v3048_v28  ;;  %v3105_v47 = vor.u32 %v3478_v43, %v3104_v42  ;;  %v3061_v29 = vor.u32 %v3465_v19, %v3058_v21  ;;  %v3042_v42 = vld [vmem:[#allocation8 + $0x58] sm:$0xf0]  ;;  %v3453_v19 = vld [vmem:[#allocation8 + $0x14] sm:$0xf] }
  0xcf   :  { %1621 = vmatpush.bf16.msra.mxu2 %v2785_v34  ;;  %v3480_v34 = vld [vmem:[#allocation8 + $0xe4] sm:$0xf0]  ;;  %v3469_v21 = vld [vmem:[#allocation8 + $0x94] sm:$0xf] }
  0xd0   :  { %1608 = vmatpush.bf16.msra.mxu3 %v2657_v33  ;;  %v3112_v33 = vld [vmem:[#allocation8 + $0xe0] sm:$0xf] }
  0xd1   :  { %1635 = vmatpush.bf16.msra.mxu0 %v2897_v60  ;;  %v3113_v41 = vor.u32 %v3480_v34, %v3112_v33  ;;  %v3474_v60 = vld [vmem:[#allocation8 + $0xb4] sm:$0xf0]  ;;  %v3463_v33 = vld [vmem:[#allocation8 + $0x64] sm:$0xf]  ;;  %v3050_v34 = vld [vmem:[#allocation8 + $0x68] sm:$0xf0] }
  0xd2   :  { %1597 = vmatpush.bf16.msrb.mxu1 %v2497_v54 }
  0xd3   :  { %1622 = vmatpush.bf16.msra.mxu2 %v2769_v51  ;;  %v3476_v51 = vld [vmem:[#allocation8 + $0xc4] sm:$0xf0] }
  0xd4   :  { %1609 = vmatpush.bf16.msra.mxu3 %v2641_v50  ;;  %v3096_v50 = vld [vmem:[#allocation8 + $0xc0] sm:$0xf] }
  0xd5   :  { %1636 = vmatpush.bf16.msra.mxu0 %v2881_v15  ;;  %v1353_v48 = vpop.f32.mrf.mxu0  ;;  %v1381_v54 = vpop.f32.mrf.mxu2  ;;  %v3097_v59 = vor.u32 %v3476_v51, %v3096_v50  ;;  %v3475_v50 = vld [vmem:[#allocation8 + $0xc4] sm:$0xf]  ;;  %v3098_v51 = vld [vmem:[#allocation8 + $0xc8] sm:$0xf0] }
  0xd6   :  { %1598 = vmatpush.bf16.msrb.mxu1 %v2481_v10  ;;  %v1354_v32 = vadd.f32 %v1353_v48, %v1341_v53  ;;  %v3008_v10 = vld [vmem:[#allocation8 + $0x10] sm:$0xf]  ;;  %v3498_v54 = vld [vmem:[#allocation8 + $0x174] sm:$0xf0] }
  0xd7   :  { %1623 = vmatpush.bf16.msra.mxu2 %v2753_v7  ;;  %v3009_v15 = vor.u32 %v3454_v11, %v3008_v10  ;;  %v3471_v10 = vld [vmem:[#allocation8 + $0xa4] sm:$0xf]  ;;  %v3082_v11 = vld [vmem:[#allocation8 + $0xa8] sm:$0xf0] }
  0xd8   :  { %1610 = vmatpush.bf16.msra.mxu3 %v2625_v6  ;;  %v3017_v6 = vor.u32 %v3456_v0, %v3016_v63  ;;  %v3473_v63 = vld [vmem:[#allocation8 + $0xb4] sm:$0xf]  ;;  %v3090_v0 = vld [vmem:[#allocation8 + $0xb8] sm:$0xf0] }
  0xd9   :  { %1599 = vmatmul.bf16.vlgmr.msrb.gmra.mxu1 %v3693_v52  ;;  %1637 = vmatpush.bf16.msra.mxu0 %v2865_v27  ;;  %v3041_v52 = vor.u32 %v3462_v40, %v3040_v39  ;;  %v3053_v40 = vor.u32 %v3463_v33, %v3050_v34  ;;  %v3066_v34 = vld [vmem:[#allocation8 + $0x88] sm:$0xf0] }
  0xda   :  { %1650 = vmatpush.bf16.msra.mxu1 %v2993_v16  ;;  %v3000_v16 = vld [vmem:[#allocation8] sm:$0xf] }
  0xdb   :  { %1624 = vmatpush.bf16.msra.mxu2 %v2737_v25  ;;  %v3122_v25 = vld [vmem:[#allocation8 + $0xf8] sm:$0xf0] }
  0xdc   :  { %1611 = vmatpush.bf16.msra.mxu3 %v2609_v24  ;;  %1638 = vmatmul.bf16.vlgmr.msra.gmra.mxu0 %v3711_v36  ;;  %v3088_v36 = vld [vmem:[#allocation8 + $0xb0] sm:$0xf]  ;;  %v3481_v24 = vld [vmem:[#allocation8 + $0xf4] sm:$0xf] }
  0xdd   :  { %v3089_v1 = vor.u32 %v3474_v60, %v3088_v36  ;;  %v1355_v38 = vpop.f32.mrf.mxu0  ;;  %v3125_v35 = vor.u32 %v3481_v24, %v3122_v25  ;;  %v3026_v36 = vld [vmem:[#allocation8 + $0x38] sm:$0xf0]  ;;  %v3101_v60 = vor.u32 %v3475_v50, %v3098_v51  ;;  %v3160_v24 = vld [vmem:[#allocation8 + $0x140] sm:$0xf]  ;;  %v3492_v25 = vld [vmem:[#allocation8 + $0x144] sm:$0xf0] }
  0xde   :  { %2071 = vmatpush.bf16.msrb.mxu1 %v3121_v30  ;;  %1625 = vmatmul.bf16.vlgmr.msra.gmra.mxu2 %v3709_v31  ;;  %v3458_v31 = vld [vmem:[#allocation8 + $0x34] sm:$0xf0]  ;;  %v3752_v2 = vpop.f32.mrf.mxu3  ;;  %v3065_v30 = vor.u32 %v3468_v23, %v3064_v22  ;;  %v3074_v22 = vld [vmem:[#allocation8 + $0x98] sm:$0xf0]  ;;  %v3136_v51 = vld [vmem:[#allocation8 + $0x110] sm:$0xf] }
  0xdf   :  { %1612 = vmatmul.bf16.vlgmr.msra.gmra.mxu3 %v3697_v58  ;;  %v1366_v58 = vpop.f32.mrf.mxu1  ;;  %v3025_v61 = vor.u32 %v3458_v31, %v3024_v57  ;;  %v3457_v57 = vld [vmem:[#allocation8 + $0x34] sm:$0xf] }
  0xe0   :  { %2058 = vmatpush.bf16.msrb.mxu3 %v3057_v8  ;;  %v1367_v62 = vadd.f32 %v1366_v58, %v1354_v32  ;;  %v3001_v8 = vor.u32 %v3452_v18, %v3000_v16  ;;  %v3184_v58 = vld [vmem:[#allocation8 + $0x170] sm:$0xf]  ;;  %v3029_v38 = vor.u32 %v3457_v57, %v3026_v36  ;;  %v3484_v57 = vld [vmem:[#allocation8 + $0x104] sm:$0xf0]  ;;  %v3186_v36 = vld [vmem:[#allocation8 + $0x178] sm:$0xf0] }
  0xe1   :  { %v3756_v7 = vpop.f32.mrf.mxu2  ;;  %v3185_v31 = vor.u32 %v3498_v54, %v3184_v58 }
  0xe2   :  { %2072 = vmatpush.bf16.msrb.mxu1 %v3113_v41  ;;  %v1380_v9 = vadd.f32 %v1379_v17, %v1367_v62  ;;  %v3479_v17 = vld [vmem:[#allocation8 + $0xe4] sm:$0xf]  ;;  %v3461_v41 = vld [vmem:[#allocation8 + $0x54] sm:$0xf]  ;;  %v3496_v62 = vld [vmem:[#allocation8 + $0x164] sm:$0xf0] }
  0xe3   :  { %v3045_v26 = vor.u32 %v3461_v41, %v3042_v42  ;;  %2084 = vmatpush.bf16.msrb.mxu2 %v3185_v31  ;;  %v3497_v31 = vld [vmem:[#allocation8 + $0x174] sm:$0xf] }
  0xe4   :  { %2059 = vmatpush.bf16.msrb.mxu3 %v3049_v37  ;;  %v1656_v56 = vmul.f32 0.2, %v1380_v9  ;;  %v3114_v37 = vld [vmem:[#allocation8 + $0xe8] sm:$0xf0] }
  0xe5   :  { %v3117_v43 = vor.u32 %v3479_v17, %v3114_v37  ;;  %v3152_v17 = vld [vmem:[#allocation8 + $0x130] sm:$0xf]  ;;  %v3490_v37 = vld [vmem:[#allocation8 + $0x134] sm:$0xf0] }
  0xe6   :  { %2073 = vmatpush.bf16.msrb.mxu1 %v3105_v47  ;;  %v1394_v20 = vpop.f32.mrf.mxu3  ;;  %v1660_v28 = vmax.f32 %v1380_v9, %v1656_v56  ;;  %v3034_v47 = vld [vmem:[#allocation8 + $0x48] sm:$0xf0] }
  0xe7   :  { %v1368_v5 = vpop.f32.mrf.mxu1  ;;  %v3037_v32 = vor.u32 %v3459_v45, %v3034_v47  ;;  %v3085_v20 = vor.u32 %v3471_v10, %v3082_v11 }
  0xe8   :  { %2060 = vmatpush.bf16.msrb.mxu3 %v3041_v52  ;;  %v3758_v39 = vpack.c.bf16 %v1660_v28, %v1660_v28  ;;  %v3106_v52 = vld [vmem:[#allocation8 + $0xd8] sm:$0xf0]  ;;  %v3018_v5 = vld [vmem:[#allocation8 + $0x28] sm:$0xf0]  ;;  %v3451_v28 = vld [vmem:[#allocation8 + $0x4] sm:$0xf] }
  0xe9   :  { %2997 = vmatmul.msk.bf16.vlgmr.msra.gmra.mxu1 %vm1288_vm0, %v3705_v46  ;;  %v3073_v46 = vor.u32 %v3470_v14, %v3072_v13  ;;  %v1407_v27 = vpop.f32.mrf.mxu2  ;;  %v3109_v48 = vor.u32 %v3477_v44, %v3106_v52  ;;  %v3168_v13 = vld [vmem:[#allocation8 + $0x150] sm:$0xf]  ;;  %v3494_v14 = vld [vmem:[#allocation8 + $0x154] sm:$0xf0]  ;;  %v3021_v16 = vor.u32 %v3455_v4, %v3018_v5  ;;  %v3488_v44 = vld [vmem:[#allocation8 + $0x124] sm:$0xf0] }
  0xea   :  { %2074 = vmatpush.bf16.msrb.mxu1 %v3097_v59  ;;  %v3169_v56 = vor.u32 %v3494_v14, %v3168_v13  ;;  %v3161_v27 = vor.u32 %v3492_v25, %v3160_v24  ;;  %v3514_v4 = vld [vmem:[#allocation8 + $0x1f4] sm:$0xf0]  ;;  %v3240_v13 = vld [vmem:[#allocation8 + $0x1e0] sm:$0xf]  ;;  %v3512_v14 = vld [vmem:[#allocation8 + $0x1e4] sm:$0xf0] }
  0xec   :  { %2061 = vmatpush.bf16.msrb.mxu3 %v3033_v55  ;;  %v301_v55 = vperm.slane %v3741_v49, 1 }
  0xee   :  { %2075 = vmatpush.bf16.msrb.mxu1 %v3089_v1  ;;  %v1393_v3 = vadd.f32 %v3752_v2, %v301_v55 }
  0xf0   :  { %2062 = vmatpush.bf16.msrb.mxu3 %v3025_v61  ;;  %v3176_v61 = vld [vmem:[#allocation8 + $0x160] sm:$0xf]  ;;  %v1406_v18 = vadd.f32 %v3756_v7, %v1393_v3  ;;  %v3467_v7 = vld [vmem:[#allocation8 + $0x84] sm:$0xf]  ;;  %v3248_v3 = vld [vmem:[#allocation8 + $0x1f0] sm:$0xf] }
  0xf1   :  { %v3177_v1 = vor.u32 %v3496_v62, %v3176_v61  ;;  %v3189_v61 = vor.u32 %v3497_v31, %v3186_v36  ;;  %v3249_v5 = vor.u32 %v3514_v4, %v3248_v3  ;;  %v3192_v31 = vld [vmem:[#allocation8 + $0x180] sm:$0xf]  ;;  %v3511_v4 = vld [vmem:[#allocation8 + $0x1e4] sm:$0xf] }
  0xf2   :  { %2076 = vmatpush.bf16.msrb.mxu1 %v3081_v12 }
  0xf3   :  { %2085 = vmatpush.bf16.msrb.mxu2 %v3177_v1  ;;  %v3178_v1 = vld [vmem:[#allocation8 + $0x168] sm:$0xf0]  ;;  %2097 = vmatpush.bf16.msrb.mxu0 %v3249_v5 }
  0xf4   :  { %2063 = vmatpush.bf16.msrb.mxu3 %v3017_v6  ;;  %v3093_v6 = vor.u32 %v3473_v63, %v3090_v0  ;;  %v3242_v5 = vld [vmem:[#allocation8 + $0x1e8] sm:$0xf0] }
  0xf5   :  { %v1418_v53 = vpop.f32.mrf.mxu0 }
  0xf6   :  { %2077 = vmatpush.bf16.msrb.mxu1 %v3073_v46  ;;  %v1431_v59 = vpop.f32.mrf.mxu1  ;;  %v3010_v46 = vld [vmem:[#allocation8 + $0x18] sm:$0xf0]  ;;  %v1419_v23 = vadd.f32 %v1418_v53, %v1406_v18  ;;  %v3486_v53 = vld [vmem:[#allocation8 + $0x114] sm:$0xf0]  ;;  %v3491_v18 = vld [vmem:[#allocation8 + $0x144] sm:$0xf] }
  0xf7   :  { %2086 = vmatpush.bf16.msrb.mxu2 %v3169_v56  ;;  %v3137_v54 = vor.u32 %v3486_v53, %v3136_v51  ;;  %v3130_v51 = vld [vmem:[#allocation8 + $0x108] sm:$0xf0]  ;;  %v3200_v53 = vld [vmem:[#allocation8 + $0x190] sm:$0xf] }
  0xf8   :  { %2064 = vmatpush.bf16.msrb.mxu3 %v3009_v15 }
  0xfa   :  { %2078 = vmatpush.bf16.msrb.mxu1 %v3065_v30  ;;  %v3077_v30 = vor.u32 %v3469_v21, %v3074_v22  ;;  %v3489_v22 = vld [vmem:[#allocation8 + $0x134] sm:$0xf] }
  0xfb   :  { %2087 = vmatpush.bf16.msrb.mxu2 %v3161_v27  ;;  %v3224_v27 = vld [vmem:[#allocation8 + $0x1c0] sm:$0xf] }
  0xfc   :  { %2065 = vmatpush.bf16.msrb.mxu3 %v3001_v8  ;;  %v3013_v8 = vor.u32 %v3453_v19, %v3010_v46  ;;  %v3162_v19 = vld [vmem:[#allocation8 + $0x148] sm:$0xf0] }
  0xfd   :  { %v1420_v12 = vpop.f32.mrf.mxu0  ;;  %v3165_v46 = vor.u32 %v3491_v18, %v3162_v19  ;;  %v3507_v18 = vld [vmem:[#allocation8 + $0x1c4] sm:$0xf]  ;;  %v3226_v19 = vld [vmem:[#allocation8 + $0x1c8] sm:$0xf0] }
  0xfe   :  { %2123 = vmatpush.bf16.msra.mxu1 %v3125_v35  ;;  %v1444_v9 = vpop.f32.mrf.mxu3  ;;  %v1433_v2 = vpop.f32.mrf.mxu1  ;;  %v1432_v35 = vadd.f32 %v1431_v59, %v1419_v23  ;;  %v3154_v23 = vld [vmem:[#allocation8 + $0x138] sm:$0xf0] }
  0xff   :  { %2066 = vmatmul.bf16.vlgmr.msrb.gmra.mxu3 %v3758_v39  ;;  %v3232_v2 = vld [vmem:[#allocation8 + $0x1d0] sm:$0xf] }
 0x100   :  { %2110 = vmatpush.bf16.msra.mxu3 %v3061_v29  ;;  %v3002_v29 = vld [vmem:[#allocation8 + $0x8] sm:$0xf0]  ;;  %v1445_v52 = vadd.f32 %v1444_v9, %v1432_v35  ;;  %v3170_v9 = vld [vmem:[#allocation8 + $0x158] sm:$0xf0]  ;;  %v302_v35 = vperm.slane %v3741_v49, 2 }
 0x101   :  { %v1457_v15 = vpop.f32.mrf.mxu2  ;;  %v3005_v41 = vor.u32 %v3451_v28, %v3002_v29  ;;  %v3508_v28 = vld [vmem:[#allocation8 + $0x1c4] sm:$0xf0]  ;;  %v3487_v29 = vld [vmem:[#allocation8 + $0x124] sm:$0xf] }
 0x102   :  { %2124 = vmatpush.bf16.msra.mxu1 %v3117_v43  ;;  %v3153_v43 = vor.u32 %v3490_v37, %v3152_v17  ;;  %v1458_v47 = vadd.f32 %v1457_v15, %v1445_v52  ;;  %v3241_v15 = vor.u32 %v3512_v14, %v3240_v13 }
 0x104   :  { %2111 = vmatpush.bf16.msra.mxu3 %v3053_v40  ;;  %v3144_v40 = vld [vmem:[#allocation8 + $0x120] sm:$0xf]  ;;  %2088 = vmatpush.bf16.msrb.mxu2 %v3153_v43  ;;  %v3138_v43 = vld [vmem:[#allocation8 + $0x118] sm:$0xf0] }
 0x105   :  { %v3145_v45 = vor.u32 %v3488_v44, %v3144_v40  ;;  %2098 = vmatpush.bf16.msrb.mxu0 %v3241_v15 }
 0x106   :  { %2125 = vmatpush.bf16.msra.mxu1 %v3109_v48  ;;  %v1446_v33 = vpop.f32.mrf.mxu3 }
 0x107   :  { %v3146_v33 = vld [vmem:[#allocation8 + $0x128] sm:$0xf0] }
 0x108   :  { %2112 = vmatpush.bf16.msra.mxu3 %v3045_v26  ;;  %v3069_v26 = vor.u32 %v3467_v7, %v3066_v34  ;;  %2089 = vmatpush.bf16.msrb.mxu2 %v3145_v45  ;;  %v3216_v7 = vld [vmem:[#allocation8 + $0x1b0] sm:$0xf]  ;;  %v3506_v34 = vld [vmem:[#allocation8 + $0x1b4] sm:$0xf0]  ;;  %v3149_v37 = vor.u32 %v3487_v29, %v3146_v33  ;;  %v3504_v45 = vld [vmem:[#allocation8 + $0x1a4] sm:$0xf0] }
 0x109   :  { %v1459_v42 = vpop.f32.mrf.mxu2  ;;  %v3217_v40 = vor.u32 %v3506_v34, %v3216_v7  ;;  %v3202_v29 = vld [vmem:[#allocation8 + $0x198] sm:$0xf0] }
 0x10a   :  { %2126 = vmatpush.bf16.msra.mxu1 %v3101_v60  ;;  %v3485_v42 = vld [vmem:[#allocation8 + $0x114] sm:$0xf] }
 0x10b   :  { %v3141_v52 = vor.u32 %v3485_v42, %v3138_v43 }
 0x10c   :  { %2113 = vmatpush.bf16.msra.mxu3 %v3037_v32  ;;  %2090 = vmatpush.bf16.msrb.mxu2 %v3137_v54  ;;  %v3128_v32 = vld [vmem:[#allocation8 + $0x100] sm:$0xf]  ;;  %v3502_v54 = vld [vmem:[#allocation8 + $0x194] sm:$0xf0] }
 0x10d   :  { %v3129_v59 = vor.u32 %v3484_v57, %v3128_v32  ;;  %v3201_v32 = vor.u32 %v3502_v54, %v3200_v53 }
 0x10e   :  { %2127 = vmatpush.bf16.msra.mxu1 %v3093_v6  ;;  %v1470_v48 = vpop.f32.mrf.mxu3  ;;  %v3493_v6 = vld [vmem:[#allocation8 + $0x154] sm:$0xf] }
 0x10f   :  { %v1471_v50 = vadd.f32 %v1470_v48, %v1458_v47  ;;  %v3173_v12 = vor.u32 %v3493_v6, %v3170_v9 }
 0x110   :  { %2114 = vmatpush.bf16.msra.mxu3 %v3029_v38  ;;  %2091 = vmatpush.bf16.msrb.mxu2 %v3129_v59  ;;  %v3500_v59 = vld [vmem:[#allocation8 + $0x184] sm:$0xf0] }
 0x111   :  { %v1657_v58 = vmul.f32 0.2, %v1471_v50  ;;  %v3193_v36 = vor.u32 %v3500_v59, %v3192_v31  ;;  %v1732_v31 = vld [vmem:[%s3783_s4] sm:$0x3] }
 0x112   :  { %2128 = vmatpush.bf16.msra.mxu1 %v3085_v20  ;;  %v3510_v20 = vld [vmem:[#allocation8 + $0x1d4] sm:$0xf0]  ;;  %v1734_v59 = vperm.slane %v1732_v31, 0 }
 0x113   :  { %v1661_v55 = vmax.f32 %v1471_v50, %v1657_v58  ;;  %v3233_v21 = vor.u32 %v3510_v20, %v3232_v2  ;;  %v3483_v50 = vld [vmem:[#allocation8 + $0x104] sm:$0xf]  ;;  %v3229_v20 = vor.u32 %v3507_v18, %v3226_v19 }
 0x114   :  { %2115 = vmatpush.bf16.msra.mxu3 %v3021_v16  ;;  %2136 = vmatpush.bf16.msra.mxu2 %v3189_v61  ;;  %v3133_v58 = vor.u32 %v3483_v50, %v3130_v51  ;;  %v3250_v61 = vld [vmem:[#allocation8 + $0x1f8] sm:$0xf0]  ;;  %v2166_v18 = vld [vmem:[%s3784_s5] sm:$0x3] }
 0x115   :  { %v1665_v60 = vpack.c.bf16 %v1661_v55, %v1661_v55  ;;  %v3765_v63 = vpop.f32.mrf.mxu0  ;;  %2099 = vmatpush.bf16.msrb.mxu0 %v3233_v21  ;;  %v3505_v21 = vld [vmem:[#allocation8 + $0x1b4] sm:$0xf] }
 0x116   :  { %2129 = vmatpush.bf16.msra.mxu1 %v3077_v30  ;;  %v1472_v62 = vpop.f32.mrf.mxu3  ;;  %v1483_v0 = vpop.f32.mrf.mxu1  ;;  %v3225_v30 = vor.u32 %v3508_v28, %v3224_v27  ;;  %v303_v27 = vperm.slane %v3741_v49, 3  ;;  %v3501_v28 = vld [vmem:[#allocation8 + $0x194] sm:$0xf] }
 0x117   :  { %2079 = vmatmul.bf16.vlgmr.msrb.gmra.mxu1 %v1665_v60 }
 0x118   :  { %2116 = vmatpush.bf16.msra.mxu3 %v3013_v8  ;;  %v3157_v8 = vor.u32 %v3489_v22, %v3154_v23  ;;  %v3218_v22 = vld [vmem:[#allocation8 + $0x1b8] sm:$0xf0] }
 0x119   :  { %2100 = vmatpush.bf16.msrb.mxu0 %v3225_v30  ;;  %v3221_v23 = vor.u32 %v3505_v21, %v3218_v22  ;;  %v3205_v30 = vor.u32 %v3501_v28, %v3202_v29  ;;  %v2169_v21 = vperm.slane %v2166_v18, 1 }
 0x11a   :  { %2130 = vmatpush.bf16.msra.mxu1 %v3069_v26  ;;  %v3208_v26 = vld [vmem:[#allocation8 + $0x1a0] sm:$0xf] }
 0x11b   :  { %v3209_v47 = vor.u32 %v3504_v45, %v3208_v26 }
 0x11c   :  { %2117 = vmatpush.bf16.msra.mxu3 %v3005_v41  ;;  %v1484_v41 = vadd.f32 %v1483_v0, %v302_v35  ;;  %v3499_v35 = vld [vmem:[#allocation8 + $0x184] sm:$0xf] }
 0x11d   :  { %v1511_v11 = vpop.f32.mrf.mxu0  ;;  %2101 = vmatpush.bf16.msrb.mxu0 %v3217_v40 }
 0x11e   :  { %v1485_v56 = vpop.f32.mrf.mxu1  ;;  %v3509_v11 = vld [vmem:[#allocation8 + $0x1d4] sm:$0xf] }
 0x11f   :  { %2118 = vmatmul.bf16.vlgmr.msra.gmra.mxu3 %v3758_v39  ;;  %v3495_v39 = vld [vmem:[#allocation8 + $0x164] sm:$0xf] }
 0x120   :  { %v3181_v38 = vor.u32 %v3495_v39, %v3178_v1 }
 0x121   :  { %v1522_v16 = vpop.f32.mrf.mxu2  ;;  %2102 = vmatpush.bf16.msrb.mxu0 %v3209_v47 }
 0x122   :  { %2137 = vmatpush.bf16.msra.mxu2 %v3181_v38  ;;  %v1496_v10 = vpop.f32.mrf.mxu3 }
 0x123   :  { %v1497_v48 = vadd.f32 %v1496_v10, %v1484_v41 }
 0x125   :  { %v1561_v25 = vpop.f32.mrf.mxu0  ;;  %v1510_v57 = vadd.f32 %v3765_v63, %v1497_v48  ;;  %2103 = vmatpush.bf16.msrb.mxu0 %v3201_v32  ;;  %v3245_v63 = vor.u32 %v3511_v4, %v3242_v5 }
 0x126   :  { %2138 = vmatpush.bf16.msra.mxu2 %v3173_v12  ;;  %v3234_v12 = vld [vmem:[#allocation8 + $0x1d8] sm:$0xf0] }
 0x127   :  { %2131 = vmatmul.bf16.vlgmr.msra.gmra.mxu1 %v1665_v60  ;;  %v3513_v60 = vld [vmem:[#allocation8 + $0x1f4] sm:$0xf]  ;;  %v1523_v62 = vadd.f32 %v1522_v16, %v1510_v57  ;;  %v3237_v15 = vor.u32 %v3509_v11, %v3234_v12 }
 0x128   :  { %v3253_v39 = vor.u32 %v3513_v60, %v3250_v61 }
 0x129   :  { %v1524_v17 = vpop.f32.mrf.mxu2  ;;  %2104 = vmatpush.bf16.msrb.mxu0 %v3193_v36 }
 0x12a   :  { %2139 = vmatpush.bf16.msra.mxu2 %v3165_v46  ;;  %v1498_v24 = vpop.f32.mrf.mxu3  ;;  %v3194_v17 = vld [vmem:[#allocation8 + $0x188] sm:$0xf0] }
 0x12b   :  { %v3503_v24 = vld [vmem:[#allocation8 + $0x1a4] sm:$0xf]  ;;  %v3197_v40 = vor.u32 %v3499_v35, %v3194_v17 }
 0x12d   :  { %v1563_v44 = vpop.f32.mrf.mxu0  ;;  %2149 = vmatpush.bf16.msra.mxu0 %v3253_v39 }
 0x12e   :  { %2140 = vmatpush.bf16.msra.mxu2 %v3157_v8 }
 0x131   :  { %2150 = vmatpush.bf16.msra.mxu0 %v3245_v63 }
 0x132   :  { %2141 = vmatpush.bf16.msra.mxu2 %v3149_v37 }
 0x135   :  { %2151 = vmatpush.bf16.msra.mxu0 %v3237_v15 }
 0x136   :  { %2142 = vmatpush.bf16.msra.mxu2 %v3141_v52  ;;  %v1535_v55 = vpop.f32.mrf.mxu1 }
 0x137   :  { %v1536_v1 = vadd.f32 %v1535_v55, %v1523_v62 }
 0x139   :  { %v1587_v0 = vpop.f32.mrf.mxu0  ;;  %2152 = vmatpush.bf16.msra.mxu0 %v3229_v20  ;;  %v2168_v20 = vperm.slane %v2166_v18, 0 }
 0x13a   :  { %2143 = vmatpush.bf16.msra.mxu2 %v3133_v58 }
 0x13d   :  { %2153 = vmatpush.bf16.msra.mxu0 %v3221_v23 }
 0x13e   :  { %v1537_v38 = vpop.f32.mrf.mxu1 }
 0x141   :  { %v1574_v9 = vpop.f32.mrf.mxu2  ;;  %v1589_v14 = vpop.f32.mrf.mxu0 }
 0x142   :  { %v1548_v3 = vpop.f32.mrf.mxu3  ;;  %v1575_v33 = vadd.f32 %v1574_v9, %v303_v27  ;;  %v3523_v27 = vld [vmem:[#allocation2] ss:$0 sm:$0xff] }
 0x143   :  { %v1549_v6 = vadd.f32 %v1548_v3, %v1536_v1  ;;  %v1735_v1 = vperm.slane %v1732_v31, 1 }
 0x144   :  { %v1588_v34 = vadd.f32 %v1587_v0, %v1575_v33 }
 0x145   :  { %v1562_v10 = vadd.f32 %v1561_v25, %v1549_v6  ;;  %v3210_v25 = vld [vmem:[#allocation8 + $0x1a8] sm:$0xf0] }
 0x146   :  { %v3213_v8 = vor.u32 %v3503_v24, %v3210_v25 }
 0x147   :  { %v1658_v13 = vmul.f32 0.2, %v1562_v10 }
 0x148   :  { %2154 = vmatpush.bf16.msra.mxu0 %v3213_v8 }
 0x149   :  { %v1662_v16 = vmax.f32 %v1562_v10, %v1658_v13  ;;  %v1576_v2 = vpop.f32.mrf.mxu2 }
 0x14a   :  { %v1550_v56 = vpop.f32.mrf.mxu3 }
 0x14b   :  { %v1666_v46 = vpack.c.bf16 %v1662_v16, %v1662_v16 }
 0x14c   :  { %2155 = vmatpush.bf16.msra.mxu0 %v3205_v30 }
 0x14d   :  { %2092 = vmatmul.bf16.vlgmr.msrb.gmra.mxu2 %v1666_v46 }
 0x150   :  { %2156 = vmatpush.bf16.msra.mxu0 %v3197_v40 }
 0x156   :  { %v1600_v7 = vpop.f32.mrf.mxu1 }
 0x157   :  { %v1601_v41 = vadd.f32 %v1600_v7, %v1588_v34 }
 0x159   :  { %v1639_v37 = vpop.f32.mrf.mxu0 }
 0x15d   :  { %2144 = vmatmul.bf16.vlgmr.msra.gmra.mxu2 %v1666_v46 }
 0x15e   :  { %v1602_v42 = vpop.f32.mrf.mxu1 }
 0x161   :  { %v1626_v52 = vpop.f32.mrf.mxu2  ;;  %v1641_v26 = vpop.f32.mrf.mxu0 }
 0x162   :  { %v1613_v43 = vpop.f32.mrf.mxu3 }
 0x163   :  { %v1614_v44 = vadd.f32 %v1613_v43, %v1601_v41 }
 0x165   :  { %v1627_v49 = vadd.f32 %v1626_v52, %v1614_v44 }
 0x166   :  { %v1652_v47 = vpop.f32.mrf.mxu1 }
 0x167   :  { %v1640_v45 = vadd.f32 %v1639_v37, %v1627_v49 }
 0x169   :  { %v1653_v48 = vadd.f32 %v1652_v47, %v1640_v45  ;;  %v1628_v51 = vpop.f32.mrf.mxu2 }
 0x16a   :  { %v1615_v50 = vpop.f32.mrf.mxu3 }
 0x16b   :  { %v1659_v53 = vmul.f32 0.2, %v1653_v48 }
 0x16d   :  { %v1663_v58 = vmax.f32 %v1653_v48, %v1659_v53 }
 0x16e   :  { %v1654_v55 = vpop.f32.mrf.mxu1 }
 0x16f   :  { %v1667_v54 = vpack.c.bf16 %v1663_v58, %v1663_v58 }
 0x171   :  { %2105 = vmatmul.bf16.vlgmr.msrb.gmra.mxu0 %v1667_v54 }
 0x181   :  { %2157 = vmatmul.bf16.vlgmr.msra.gmra.mxu0 %v1667_v54 }
 0x182   :  { %v2067_v32 = vpop.f32.mrf.mxu3 }
 0x183   :  { %v2068_v60 = vadd.f32 %v2067_v32, %v1734_v59 }
 0x18a   :  { %v2069_v57 = vpop.f32.mrf.mxu3 }
 0x194   :  { %v2080_v61 = vpop.f32.mrf.mxu1 }
 0x195   :  { %v2081_v62 = vadd.f32 %v2080_v61, %v2068_v60 }
 0x19c   :  { %v2082_v39 = vpop.f32.mrf.mxu1 }
 0x1a2   :  { %v2119_v36 = vpop.f32.mrf.mxu3 }
 0x1a3   :  { %v2120_v38 = vadd.f32 %v2119_v36, %v1735_v1 }
 0x1a4   :  { %v2132_v3 = vpop.f32.mrf.mxu1 }
 0x1a5   :  { %v2133_v4 = vadd.f32 %v2132_v3, %v2120_v38 }
 0x1aa   :  { %v2121_v0 = vpop.f32.mrf.mxu3 }
 0x1ac   :  { %v2134_v5 = vpop.f32.mrf.mxu1 }
 0x1d0   :  { %v2093_v6 = vpop.f32.mrf.mxu2 }
 0x1d1   :  { %v2094_v13 = vadd.f32 %v2093_v6, %v2081_v62 }
 0x1d8   :  { %v2095_v9 = vpop.f32.mrf.mxu2 }
 0x1e0   :  { %v2145_v63 = vpop.f32.mrf.mxu2 }
 0x1e1   :  { %v2146_v15 = vadd.f32 %v2145_v63, %v2133_v4 }
 0x1e8   :  { %v2147_v10 = vpop.f32.mrf.mxu2 }
 0x1ee   :  { %v2106_v11 = vpop.f32.mrf.mxu0 }
 0x1ef   :  { %v2107_v14 = vadd.f32 %v2106_v11, %v2094_v13 }
 0x1f1   :  { %v2162_v16 = vmul.f32 0.2, %v2107_v14 }
 0x1f3   :  { %v2164_v46 = vmax.f32 %v2107_v14, %v2162_v16 }
 0x1f5   :  { %v2172_v23 = vmul.f32 %v2168_v20, %v2164_v46 }
 0x1f6   :  { %v2108_v12 = vpop.f32.mrf.mxu0 }
 0x1fe   :  { %v2158_v56 = vpop.f32.mrf.mxu0 }
 0x1ff   :  { %v2159_v19 = vadd.f32 %v2158_v56, %v2146_v15 }
 0x201   :  { %v2163_v2 = vmul.f32 0.2, %v2159_v19 }
 0x203   :  { %v2165_v22 = vmax.f32 %v2159_v19, %v2163_v2 }
 0x205   :  { %v2173_v24 = vmul.f32 %v2169_v21, %v2165_v22 }
 0x206   :  { %v2160_v25 = vpop.f32.mrf.mxu0 }
 0x207   :  { %v2174_v8 = vadd.f32 %v2173_v24, %v2172_v23 }
 0x209   :  { %2175 = vadd.xlane.f32.xlu0 %v2174_v8 }
 0x27c   :  { %v2176_v28 = vpop.xlane.xlu0 %2175 }
 0x27d   :  { %v2181_v29 = vadd.f32 %v3523_v27, %v2176_v28 }
 0x27f   :  { %v3254_v30 = vmul.f32 -1.442695, %v2181_v29 }
 0x281   :  { %3524 = vpow2.f32 %v3254_v30 }
 0x287   :  { %v3525_v33 = vpop.eup %3524 }
 0x288   :  { %v2185_v7 = vadd.f32 1.0, %v3525_v33 }
 0x28a   :  { %3526 = vrcp.f32 %v2185_v7  ;;  %v2197_v37 = vand.u32 2147483648, %v2185_v7  ;;  %v2195_v41 = vand.u32 2147483647, %v2185_v7  ;;  %vm2191_vm2 = vweird.f32 %v2185_v7 }
 0x28c   :  { %v2198_v43 = vor.u32 1.1754944e-38, %v2197_v37  ;;  %vm2196_vm5 = vcmp.eq.f32.partialorder %v2195_v41, 8.507059e+37 }
 0x290   :  { %v3527_v34 = vpop.eup %3526 }
 0x291   :  { %v2187_v35 = vmul.f32 %v3527_v34, %v2185_v7  ;;  %vm2192_vm1 = vweird.f32 %v3527_v34 }
 0x292   :  { %vm2193_vm3 = vmor %vm2191_vm2, %vm2192_vm1 }
 0x293   :  { %v2188_v17 = vsub.f32 1.0, %v2187_v35 }
 0x295   :  { %v2189_v40 = vmul.f32 %v3527_v34, %v2188_v17 }
 0x297   :  { %v2190_v42 = vadd.f32 %v3527_v34, %v2189_v40 }
 0x299   :  { %v2194_v44 = vsel %vm2193_vm3, %v3527_v34, %v2190_v42 }
 0x29a   :  { %v2199_v52 = vsel %vm2196_vm5, %v2198_v43, %v2194_v44 }
 0x29b   :  { %2202 = vst.msk [vmem:[%s3786_s7] sm:$0xff] %vm2201_vm4, %v2199_v52 }
 0x29c   :  { %2207 = vsyncpa [#allocation4], 1 }
 0x29d   :  { %2208 = vsyncpa [#allocation6], 1 }
 0x29e   :  { %2209 = vsyncpa [#allocation9], 1 }

</bundles_post_ra>
